<compile_context>
chip_gen: v5e
topology: v5e:2x2
jax: 0.10.0
libtpu: 0.0.40
codegen_flags: <defaults>
</compile_context>

<pallas_src>
import functools

import jax
import jax.numpy as jnp
from jax.experimental import pallas as pl
from jax.experimental.pallas import tpu as pltpu

# ----------------------------- config ---------------------------------------
C_IN = 3            # RGB
C_MID = 32          # conv channels
EMB_DIM = 32        # encoder_params.embedding_dim
TEMPERATURE = 0.1
_TILE_B_TARGET = 64          # images per grid step (VMEM-derived cap, all gens)
_VMEM_LIMIT_BYTES = 32 * 1024 * 1024


# ----------------------------- Pallas kernel --------------------------------
def _encoder_kernel(p_ref, wc_ref, bc_ref, pool_ref, wf_ref, bf_ref, o_ref):
    """TILE_B images per grid step.

    p_ref    : (TILE_B*H*W, 9*C_IN)  bf16  im2col patches (row block per step)
    wc_ref   : (9*C_IN, C_MID)       bf16  conv weight (flattened 3x3xC_IN)
    bc_ref   : (1, C_MID)            f32   conv bias
    pool_ref : (TILE_B, TILE_B*H*W)  bf16  segment-mean (global-avg-pool) matrix
    wf_ref   : (C_MID, EMB_DIM)      f32   projection weight
    bf_ref   : (1, EMB_DIM)          f32   projection bias
    o_ref    : (TILE_B, EMB_DIM)     f32   per-step output block
    """
    # 3x3 conv as one bf16 MXU matmul over all TILE_B images, f32 accumulate.
    h = jnp.dot(p_ref[...], wc_ref[...],
                preferred_element_type=jnp.float32)         # (TILE_B*HW, C_MID)
    h = jnp.maximum(h + bc_ref[...], 0.0)                   # f32 elementwise

    # Global average pool as an MXU matmul with the 0/(1/HW) pooling matrix.
    pooled = jnp.dot(pool_ref[...], h.astype(jnp.bfloat16),
                     preferred_element_type=jnp.float32)    # (TILE_B, C_MID)

    # FC projection to embedding_dim (tiny, keep in f32).
    proj = jnp.dot(pooled, wf_ref[...],
                   preferred_element_type=jnp.float32) + bf_ref[...]

    # L2 normalize (use_norm=True) — f32 throughout.
    inv_nrm = jax.lax.rsqrt(jnp.sum(proj * proj, axis=-1, keepdims=True)
                            + 1e-12)
    o_ref[...] = proj * inv_nrm


# ----------------------------- glue (plain JAX) ------------------------------
def _im2col_3x3(x_nhwc):
    """x: [N, H, W, C] -> patches [N, H*W, 9*C], pad=1, stride=1."""
    n, h, w, c = x_nhwc.shape
    xp = jnp.pad(x_nhwc, ((0, 0), (1, 1), (1, 1), (0, 0)))
    cols = []
    for dy in range(3):
        for dx in range(3):
            cols.append(xp[:, dy:dy + h, dx:dx + w, :])
    patches = jnp.concatenate(cols, axis=-1)                 # [N, H, W, 9*C]
    return patches.reshape(n, h * w, 9 * c)


def _pick_tile_b(n, target=_TILE_B_TARGET):
    """Largest tile <= target dividing n (prefer multiples of 8 for sublanes)."""
    if n <= target:
        return n
    for t in range(target, 0, -1):
        if n % t == 0 and t % 8 == 0:
            return t
    for t in range(target, 0, -1):
        if n % t == 0:
            return t
    return 1


def _encode(x_nchw, params):
    """x_nchw: [N, C_IN, H, W] float32 -> L2-normalized projections [N, EMB_DIM]."""
    n, c, h, w = x_nchw.shape
    assert c == C_IN
    hw = h * w
    k = 9 * C_IN
    tile_b = _pick_tile_b(n)
    assert n % tile_b == 0

    x_nhwc = jnp.transpose(x_nchw, (0, 2, 3, 1))
    # Pre-flattened bf16 patches: [N*H*W, 9*C]  (row-blocked per grid step).
    patches = _im2col_3x3(x_nhwc).reshape(n * hw, k).astype(jnp.bfloat16)

    wconv, bconv, wfc, bfc = params
    wconv16 = wconv.astype(jnp.bfloat16)

    # Segment-mean pooling matrix: pool[i, j] = 1/HW if j // HW == i else 0.
    pool_mat = (jnp.repeat(jnp.eye(tile_b, dtype=jnp.float32), hw, axis=1)
                / float(hw)).astype(jnp.bfloat16)            # (tile_b, tile_b*HW)

    grid = (n // tile_b,)
    return pl.pallas_call(
        _encoder_kernel,
        out_shape=jax.ShapeDtypeStruct((n, EMB_DIM), jnp.float32),
        grid=grid,
        in_specs=[
            pl.BlockSpec((tile_b * hw, k), lambda i: (i, 0)),        # patches
            pl.BlockSpec((k, C_MID), lambda i: (0, 0)),              # conv W
            pl.BlockSpec((1, C_MID), lambda i: (0, 0)),              # conv b
            pl.BlockSpec((tile_b, tile_b * hw), lambda i: (0, 0)),   # pool mat
            pl.BlockSpec((C_MID, EMB_DIM), lambda i: (0, 0)),        # fc W
            pl.BlockSpec((1, EMB_DIM), lambda i: (0, 0)),            # fc b
        ],
        # Per-step output block -> pipelined stores, safe to run "parallel".
        out_specs=pl.BlockSpec((tile_b, EMB_DIM), lambda i: (i, 0)),
        compiler_params=pltpu.CompilerParams(
            dimension_semantics=("parallel",),
            vmem_limit_bytes=_VMEM_LIMIT_BYTES),
    )(patches, wconv16, bconv, pool_mat, wfc, bfc)


def simclr_forward(img_A, img_B, params):
    """Mirrors SimCLR.forward: inputs [batch, num_crops, 3, H, W]."""
    if img_A.ndim != 5 or img_B.ndim != 5:
        raise ValueError(
            "Input images must have dimensions [batch_size, num_crops, 3, H, W].")
    b, nc, c, h, w = img_A.shape
    n = b * nc
    # One batched encoder call over both crops sets (single pallas_call).
    x_all = jnp.concatenate(
        [img_A.reshape(-1, c, h, w), img_B.reshape(-1, c, h, w)], axis=0)
    proj = _encode(x_all, params)
    return proj[:n], proj[n:]


def init_params(key):
    k1, k2, k3 = jax.random.split(key, 3)
    # conv weight stored as (3, 3, C_IN, C_MID) then flattened to (9*C_IN, C_MID)
    # matching the (dy, dx, c) patch concatenation order in _im2col_3x3.
    wconv = (jax.random.normal(k1, (3, 3, C_IN, C_MID), jnp.float32) * 0.1
             ).reshape(9 * C_IN, C_MID)
    bconv = jnp.zeros((1, C_MID), jnp.float32)
    wfc = jax.random.normal(k2, (C_MID, EMB_DIM), jnp.float32) * 0.1
    bfc = jax.random.normal(k3, (1, EMB_DIM), jnp.float32) * 0.01
    return (wconv, bconv, wfc, bfc)


# ----------------------------- main ------------------------------------------
if __name__ == "__main__":
    key = jax.random.PRNGKey(0)
    kp, ka, kb = jax.random.split(key, 3)

    batch, num_crops, H, W = 2, 2, 16, 16
    img_A = jax.random.normal(ka, (batch, num_crops, C_IN, H, W), jnp.float32)
    img_B = jax.random.normal(kb, (batch, num_crops, C_IN, H, W), jnp.float32)

    params = init_params(kp)

    proj_A, proj_B = jax.jit(functools.partial(simclr_forward, params=params)
                             )(img_A, img_B)
    jax.block_until_ready((proj_A, proj_B))

    assert proj_A.shape == (batch * num_crops, EMB_DIM)
    assert proj_B.shape == (batch * num_crops, EMB_DIM)
    # rows are L2-normalized (use_norm=True); normalization is done in f32
    assert jnp.allclose(jnp.linalg.norm(proj_A, axis=-1), 1.0, atol=1e-4)
    assert jnp.allclose(jnp.linalg.norm(proj_B, axis=-1), 1.0, atol=1e-4)

    print("KERNEL_OK")
</pallas_src>

<mosaic_0001>
module attributes {stable_mosaic.version = 11 : i64} {
  func.func @_encoder_kernel(%arg0: i32, %arg1: memref<2048x27xbf16, #tpu.memory_space<vmem>>, %arg2: memref<27x32xbf16, #tpu.memory_space<vmem>>, %arg3: memref<1x32xf32, #tpu.memory_space<vmem>>, %arg4: memref<8x2048xbf16, #tpu.memory_space<vmem>>, %arg5: memref<32x32xf32, #tpu.memory_space<vmem>>, %arg6: memref<1x32xf32, #tpu.memory_space<vmem>>, %arg7: memref<8x32xf32, #tpu.memory_space<vmem>>) attributes {dimension_semantics = [#tpu.dimension_semantics<parallel>], iteration_bounds = array<i64: 1>, scalar_prefetch = 0 : i64, scratch_operands = 0 : i64, tpu.core_type = #tpu.core_type<tc>, window_params = [{transform_indices = @transform_0, window_bounds = array<i64: 2048, 27>}, {pipeline_mode = #tpu.pipeline_mode<synchronous>, transform_indices = @transform_1, window_bounds = array<i64: 27, 32>}, {pipeline_mode = #tpu.pipeline_mode<synchronous>, transform_indices = @transform_2, window_bounds = array<i64: 1, 32>}, {pipeline_mode = #tpu.pipeline_mode<synchronous>, transform_indices = @transform_3, window_bounds = array<i64: 8, 2048>}, {pipeline_mode = #tpu.pipeline_mode<synchronous>, transform_indices = @transform_4, window_bounds = array<i64: 32, 32>}, {pipeline_mode = #tpu.pipeline_mode<synchronous>, transform_indices = @transform_5, window_bounds = array<i64: 1, 32>}, {transform_indices = @transform_6, window_bounds = array<i64: 8, 32>}]} {
    %c0 = arith.constant 0 : index
    %c0_0 = arith.constant 0 : index
    %0 = vector.load %arg1[%c0, %c0_0] : memref<2048x27xbf16, #tpu.memory_space<vmem>>, vector<2048x27xbf16>
    %c0_1 = arith.constant 0 : index
    %c0_2 = arith.constant 0 : index
    %1 = vector.load %arg2[%c0_1, %c0_2] : memref<27x32xbf16, #tpu.memory_space<vmem>>, vector<27x32xbf16>
    %cst = arith.constant dense<0.000000e+00> : vector<2048x32xf32>
    %2 = tpu.matmul %0, %1, %cst {dimension_numbers = #tpu.dot_dimension_numbers<[1], [0], [0], [1], [0, 0, 1, 1], [], []>} : vector<2048x27xbf16>, vector<27x32xbf16>, vector<2048x32xf32> -> vector<2048x32xf32>
    %c0_3 = arith.constant 0 : index
    %c0_4 = arith.constant 0 : index
    %3 = vector.load %arg3[%c0_3, %c0_4] : memref<1x32xf32, #tpu.memory_space<vmem>>, vector<1x32xf32>
    %4 = vector.broadcast %3 : vector<1x32xf32> to vector<2048x32xf32>
    %5 = arith.addf %2, %4 : vector<2048x32xf32>
    %cst_5 = arith.constant 0.000000e+00 : f32
    %6 = vector.broadcast %cst_5 : f32 to vector<2048x32xf32>
    %7 = arith.maximumf %5, %6 : vector<2048x32xf32>
    %c0_6 = arith.constant 0 : index
    %c0_7 = arith.constant 0 : index
    %8 = vector.load %arg4[%c0_6, %c0_7] : memref<8x2048xbf16, #tpu.memory_space<vmem>>, vector<8x2048xbf16>
    %9 = arith.truncf %7 : vector<2048x32xf32> to vector<2048x32xbf16>
    %cst_8 = arith.constant dense<0.000000e+00> : vector<8x32xf32>
    %10 = tpu.matmul %8, %9, %cst_8 {dimension_numbers = #tpu.dot_dimension_numbers<[1], [0], [0], [1], [0, 0, 1, 1], [], []>} : vector<8x2048xbf16>, vector<2048x32xbf16>, vector<8x32xf32> -> vector<8x32xf32>
    %c0_9 = arith.constant 0 : index
    %c0_10 = arith.constant 0 : index
    %11 = vector.load %arg5[%c0_9, %c0_10] : memref<32x32xf32, #tpu.memory_space<vmem>>, vector<32x32xf32>
    %cst_11 = arith.constant dense<0.000000e+00> : vector<8x32xf32>
    %12 = tpu.matmul %10, %11, %cst_11 {dimension_numbers = #tpu.dot_dimension_numbers<[1], [0], [0], [1], [0, 0, 1, 1], [], []>} : vector<8x32xf32>, vector<32x32xf32>, vector<8x32xf32> -> vector<8x32xf32>
    %c0_12 = arith.constant 0 : index
    %c0_13 = arith.constant 0 : index
    %13 = vector.load %arg6[%c0_12, %c0_13] : memref<1x32xf32, #tpu.memory_space<vmem>>, vector<1x32xf32>
    %14 = vector.broadcast %13 : vector<1x32xf32> to vector<8x32xf32>
    %15 = arith.addf %12, %14 : vector<8x32xf32>
    %16 = arith.mulf %15, %15 : vector<8x32xf32>
    %cst_14 = arith.constant dense<0.000000e+00> : vector<8xf32>
    %17 = vector.multi_reduction <add>, %16, %cst_14 [1] : vector<8x32xf32> to vector<8xf32>
    %18 = vector.shape_cast %17 : vector<8xf32> to vector<8x1xf32>
    %cst_15 = arith.constant 9.99999996E-13 : f32
    %19 = vector.broadcast %cst_15 : f32 to vector<8x1xf32>
    %20 = arith.addf %18, %19 : vector<8x1xf32>
    %21 = math.rsqrt %20 : vector<8x1xf32>
    %22 = vector.broadcast %21 : vector<8x1xf32> to vector<8x32xf32>
    %23 = arith.mulf %15, %22 : vector<8x32xf32>
    %c0_16 = arith.constant 0 : index
    %c0_17 = arith.constant 0 : index
    %24 = vector.load %arg7[%c0_16, %c0_17] : memref<8x32xf32, #tpu.memory_space<vmem>>, vector<8x32xf32>
    tpu.vector_store %arg7[%c0_16, %c0_17], %23 {strides = array<i32>} : memref<8x32xf32, #tpu.memory_space<vmem>>, vector<8x32xf32>,
    return
  }
  func.func @transform_0(%arg0: i32) -> (i32, i32) {
    %c0_i32 = arith.constant 0 : i32
    %c0_i32_0 = arith.constant 0 : i32
    return %arg0, %c0_i32 : i32, i32
  }
  func.func @transform_1(%arg0: i32) -> (i32, i32) {
    %c0_i32 = arith.constant 0 : i32
    %c0_i32_0 = arith.constant 0 : i32
    %c0_i32_1 = arith.constant 0 : i32
    return %c0_i32, %c0_i32_0 : i32, i32
  }
  func.func @transform_2(%arg0: i32) -> (i32, i32) {
    %c0_i32 = arith.constant 0 : i32
    %c0_i32_0 = arith.constant 0 : i32
    %c0_i32_1 = arith.constant 0 : i32
    return %c0_i32, %c0_i32_0 : i32, i32
  }
  func.func @transform_3(%arg0: i32) -> (i32, i32) {
    %c0_i32 = arith.constant 0 : i32
    %c0_i32_0 = arith.constant 0 : i32
    %c0_i32_1 = arith.constant 0 : i32
    return %c0_i32, %c0_i32_0 : i32, i32
  }
  func.func @transform_4(%arg0: i32) -> (i32, i32) {
    %c0_i32 = arith.constant 0 : i32
    %c0_i32_0 = arith.constant 0 : i32
    %c0_i32_1 = arith.constant 0 : i32
    return %c0_i32, %c0_i32_0 : i32, i32
  }
  func.func @transform_5(%arg0: i32) -> (i32, i32) {
    %c0_i32 = arith.constant 0 : i32
    %c0_i32_0 = arith.constant 0 : i32
    %c0_i32_1 = arith.constant 0 : i32
    return %c0_i32, %c0_i32_0 : i32, i32
  }
  func.func @transform_6(%arg0: i32) -> (i32, i32) {
    %c0_i32 = arith.constant 0 : i32
    %c0_i32_0 = arith.constant 0 : i32
    return %arg0, %c0_i32 : i32, i32
  }
}

</mosaic_0001>

<bundles_post_ra>
// kernel: simclr_forward.1
= control target key start
LH: loop header
LB: loop body
LE: loop exit
PB: predicated region body
PF: predicated region fallthrough
CT: control target
= control target key end

     0   :  { %vm1324_vm0 = vcmask 1044480   ;;  %vm1325_vm1 = vcmask 1045504   ;;  %v3481_v2 = vmov 65535   ;;  %vm939_vm2 = vcmask 220160   ;;  %s4986_s1 = inlined_call_operand.vmem [shape: bf16[27,32], index: 1, kind: input, shape index: {}]   ;;  %s4987_s2 = inlined_call_operand.vmem [shape: f32[1,32], index: 2, kind: input, shape index: {}]   ;;  %s4988_s0 = inlined_call_operand.vmem [shape: bf16[2048,27], index: 0, kind: input, shape index: {}]   ;;  %s4989_s3 = inlined_call_operand.vmem [shape: bf16[8,2048], index: 3, kind: input, shape index: {}]   ;;  %s4990_s5 = inlined_call_operand.vmem [shape: f32[1,32], index: 5, kind: input, shape index: {}]   ;;  %s4991_s4 = inlined_call_operand.vmem [shape: f32[32,32], index: 4, kind: input, shape index: {}]   ;;  %s4992_s6 = inlined_call_operand.vmem [shape: f32[8,32], index: 6, kind: output, shape index: {}]  }
   0x1   :  { %v3207_v0 = vld [vmem:[%s4986_s1 + $0x8] sm:$0xf]  ;;  %v3467_v1 = vld [vmem:[%s4986_s1 + $0x8] sm:$0x30]  ;;  %v1326_v3 = vsel %vm1324_vm0, 4294967295, %v3481_v2  ;;  %v3466_v7 = vld [vmem:[%s4986_s1] sm:$0xff] }
   0x2   :  { %v3208_v4 = vor.u32 %v3467_v1, %v3207_v0  ;;  %v1327_v5 = vsel %vm1325_vm1, %v1326_v3, 0  ;;  %v3338_v8 = vld [vmem:[%s4988_s0] sm:$0xff]  ;;  %v3339_v9 = vld [vmem:[%s4988_s0 + $0x8] sm:$0xff]  ;;  %v3340_v10 = vld [vmem:[%s4988_s0 + $0x10] sm:$0xff]  ;;  %vm2644_vm3 = vcmask 261120  }
   0x3   :  { %v3341_v11 = vld [vmem:[%s4988_s0 + $0x18] sm:$0xff]  ;;  %v3342_v12 = vld [vmem:[%s4988_s0 + $0x20] sm:$0xff]  ;;  %v3343_v13 = vld [vmem:[%s4988_s0 + $0x28] sm:$0xff] }
   0x4   :  { %v1329_v6 = vand.u32 %v3208_v4, %v1327_v5  ;;  %v3344_v14 = vld [vmem:[%s4988_s0 + $0x30] sm:$0xff]  ;;  %v3435_v15 = vld [vmem:[%s4988_s0 + $0x308] sm:$0xff]  ;;  %v3405_v16 = vld [vmem:[%s4988_s0 + $0x218] sm:$0xff] }
   0x5   :  { %v3345_v17 = vld [vmem:[%s4988_s0 + $0x38] sm:$0xff]  ;;  %v3436_v18 = vld [vmem:[%s4988_s0 + $0x310] sm:$0xff]  ;;  %v3406_v19 = vld [vmem:[%s4988_s0 + $0x220] sm:$0xff] }
   0x6   :  { %1337 = vmatpush.bf16.msra.mxu0 %v1329_v6  ;;  %3469 = vmatpush.bf16.msra.mxu2 %v1329_v6  ;;  %v3346_v20 = vld [vmem:[%s4988_s0 + $0x40] sm:$0xff]  ;;  %v3437_v21 = vld [vmem:[%s4988_s0 + $0x318] sm:$0xff]  ;;  %v3407_v30 = vld [vmem:[%s4988_s0 + $0x228] sm:$0xff] }
   0x7   :  { %3470 = vmatpush.bf16.msra.mxu3 %v1329_v6  ;;  %3468 = vmatpush.bf16.msra.mxu1 %v1329_v6  ;;  %v3584_v23 = vld [vmem:[%s4987_s2] ss:$0 sm:$0xff]  ;;  %v3347_v31 = vld [vmem:[%s4988_s0 + $0x48] sm:$0xff]  ;;  %v3408_v40 = vld [vmem:[%s4988_s0 + $0x230] sm:$0xff] }
   0x8   :  { %v3438_v32 = vld [vmem:[%s4988_s0 + $0x320] sm:$0xff]  ;;  %v3348_v41 = vld [vmem:[%s4988_s0 + $0x50] sm:$0xff]  ;;  %v3439_v42 = vld [vmem:[%s4988_s0 + $0x328] sm:$0xff] }
   0x9   :  { %v3409_v50 = vld [vmem:[%s4988_s0 + $0x238] sm:$0xff]  ;;  %v3440_v52 = vld [vmem:[%s4988_s0 + $0x330] sm:$0xff]  ;;  %v3410_v60 = vld [vmem:[%s4988_s0 + $0x240] sm:$0xff] }
   0xa   :  { %1338 = vmatpush.bf16.msra.mxu0 %v3466_v7  ;;  %3472 = vmatpush.bf16.msra.mxu2 %v3466_v7  ;;  %v3349_v51 = vld [vmem:[%s4988_s0 + $0x58] sm:$0xff]  ;;  %v3350_v61 = vld [vmem:[%s4988_s0 + $0x60] sm:$0xff]  ;;  %v3411_v1 = vld [vmem:[%s4988_s0 + $0x248] sm:$0xff] }
   0xb   :  { %3473 = vmatpush.bf16.msra.mxu3 %v3466_v7  ;;  %3471 = vmatpush.bf16.msra.mxu1 %v3466_v7  ;;  %v3441_v62 = vld [vmem:[%s4988_s0 + $0x338] sm:$0xff]  ;;  %v3351_v2 = vld [vmem:[%s4988_s0 + $0x68] sm:$0xff]  ;;  %v3442_v3 = vld [vmem:[%s4988_s0 + $0x340] sm:$0xff] }
   0xc   :  { %v3379_v6 = vld [vmem:[%s4988_s0 + $0x148] sm:$0xff]  ;;  %v3412_v7 = vld [vmem:[%s4988_s0 + $0x250] sm:$0xff] }
   0xd   :  { %3209 = vmatmul.msk.bf16.vlgmr.msra.gmra.mxu0 %vm939_vm2, %v3338_v8  ;;  %3276 = vmatmul.msk.bf16.vlgmr.msra.gmra.mxu2 %vm939_vm2, %v3405_v16  ;;  %v3352_v8 = vld [vmem:[%s4988_s0 + $0x70] sm:$0xff]  ;;  %v3353_v16 = vld [vmem:[%s4988_s0 + $0x78] sm:$0xff] }
   0xe   :  { %3306 = vmatmul.msk.bf16.vlgmr.msra.gmra.mxu3 %vm939_vm2, %v3435_v15  ;;  %3250 = vmatmul.msk.bf16.vlgmr.msra.gmra.mxu1 %vm939_vm2, %v3379_v6  ;;  %v3413_v15 = vld [vmem:[%s4988_s0 + $0x258] sm:$0xff] }
  0x1d   :  { %3210 = vmatmul.msk.bf16.gmra.mxu0 %vm939_vm2, %v3339_v9  ;;  %3277 = vmatmul.msk.bf16.gmra.mxu2 %vm939_vm2, %v3406_v19  ;;  %v3443_v9 = vld [vmem:[%s4988_s0 + $0x348] sm:$0xff] }
  0x1e   :  { %3307 = vmatmul.msk.bf16.gmra.mxu3 %vm939_vm2, %v3436_v18 }
  0x2d   :  { %3211 = vmatmul.msk.bf16.gmra.mxu0 %vm939_vm2, %v3340_v10  ;;  %3278 = vmatmul.msk.bf16.gmra.mxu2 %vm939_vm2, %v3407_v30 }
  0x2e   :  { %3308 = vmatmul.msk.bf16.gmra.mxu3 %vm939_vm2, %v3437_v21 }
  0x3d   :  { %3212 = vmatmul.msk.bf16.gmra.mxu0 %vm939_vm2, %v3341_v11  ;;  %3279 = vmatmul.msk.bf16.gmra.mxu2 %vm939_vm2, %v3408_v40  ;;  %v3354_v40 = vld [vmem:[%s4988_s0 + $0x80] sm:$0xff] }
  0x3e   :  { %3309 = vmatmul.msk.bf16.gmra.mxu3 %vm939_vm2, %v3438_v32 }
  0x4d   :  { %3213 = vmatmul.msk.bf16.gmra.mxu0 %vm939_vm2, %v3342_v12  ;;  %3280 = vmatmul.msk.bf16.gmra.mxu2 %vm939_vm2, %v3409_v50 }
  0x4e   :  { %3310 = vmatmul.msk.bf16.gmra.mxu3 %vm939_vm2, %v3439_v42 }
  0x5d   :  { %3214 = vmatmul.msk.bf16.gmra.mxu0 %vm939_vm2, %v3343_v13  ;;  %3281 = vmatmul.msk.bf16.gmra.mxu2 %vm939_vm2, %v3410_v60  ;;  %v3380_v13 = vld [vmem:[%s4988_s0 + $0x150] sm:$0xff] }
  0x5e   :  { %3311 = vmatmul.msk.bf16.gmra.mxu3 %vm939_vm2, %v3440_v52  ;;  %3251 = vmatmul.msk.bf16.gmra.mxu1 %vm939_vm2, %v3380_v13 }
  0x6d   :  { %3215 = vmatmul.msk.bf16.gmra.mxu0 %vm939_vm2, %v3344_v14  ;;  %3282 = vmatmul.msk.bf16.gmra.mxu2 %vm939_vm2, %v3411_v1  ;;  %v3415_v1 = vld [vmem:[%s4988_s0 + $0x268] sm:$0xff] }
  0x6e   :  { %3312 = vmatmul.msk.bf16.gmra.mxu3 %vm939_vm2, %v3441_v62 }
  0x7d   :  { %3216 = vmatmul.msk.bf16.gmra.mxu0 %vm939_vm2, %v3345_v17  ;;  %3283 = vmatmul.msk.bf16.gmra.mxu2 %vm939_vm2, %v3412_v7  ;;  %v3444_v17 = vld [vmem:[%s4988_s0 + $0x350] sm:$0xff] }
  0x7e   :  { %3313 = vmatmul.msk.bf16.gmra.mxu3 %vm939_vm2, %v3442_v3  ;;  %v3446_v3 = vld [vmem:[%s4988_s0 + $0x360] sm:$0xff] }
  0x8a   :  { %v1340_v22 = vpop.f32.mrf.mxu0 }
  0x8b   :  { %v1341_v24 = vadd.f32 %v3584_v23, %v1340_v22 }
  0x8d   :  { %3217 = vmatmul.msk.bf16.gmra.mxu0 %vm939_vm2, %v3346_v20  ;;  %v1980_v27 = vmax.f32 %v1341_v24, 0.0  ;;  %3284 = vmatmul.msk.bf16.gmra.mxu2 %vm939_vm2, %v3413_v15 }
  0x8e   :  { %3314 = vmatmul.msk.bf16.gmra.mxu3 %vm939_vm2, %v3443_v9  ;;  %v3383_v9 = vld [vmem:[%s4988_s0 + $0x168] sm:$0xff] }
  0x90   :  { %v3699_v19 = vpop.f32.mrf.mxu2 }
  0x91   :  { %v3679_v11 = vpop.f32.mrf.mxu3 }
  0x92   :  { %v1342_v25 = vpop.f32.mrf.mxu0  ;;  %4995 = vst [vmem:[#allocation2_spill] sm:$0xff] %v3679_v11 }
  0x93   :  { %v1343_v26 = vadd.f32 %v3584_v23, %v1342_v25 }
  0x95   :  { %v1981_v28 = vmax.f32 %v1343_v26, 0.0  ;;  %v3381_v26 = vld [vmem:[%s4988_s0 + $0x158] sm:$0xff] }
  0x96   :  { %3252 = vmatmul.msk.bf16.gmra.mxu1 %vm939_vm2, %v3381_v26  ;;  %v3384_v26 = vld [vmem:[%s4988_s0 + $0x170] sm:$0xff] }
  0x97   :  { %v3589_v29 = vpack.c.bf16 %v1981_v28, %v1980_v27 }
  0x99   :  { %v3685_v14 = vpop.f32.mrf.mxu3 }
  0x9a   :  { %v1345_v33 = vpop.f32.mrf.mxu0  ;;  %4996 = vst [vmem:[#allocation3_spill] sm:$0xff] %v3685_v14 }
  0x9b   :  { %v1346_v34 = vadd.f32 %v3584_v23, %v1345_v33 }
  0x9d   :  { %3218 = vmatmul.msk.bf16.gmra.mxu0 %vm939_vm2, %v3347_v31  ;;  %v1982_v37 = vmax.f32 %v1346_v34, 0.0  ;;  %v3710_v31 = vpop.f32.mrf.mxu2 }
  0x9e   :  { %3315 = vmatmul.msk.bf16.gmra.mxu3 %vm939_vm2, %v3444_v17 }
  0xa1   :  { %v3701_v20 = vpop.f32.mrf.mxu3 }
  0xa2   :  { %v1347_v35 = vpop.f32.mrf.mxu0 }
  0xa3   :  { %v1348_v36 = vadd.f32 %v3584_v23, %v1347_v35 }
  0xa5   :  { %v1983_v38 = vmax.f32 %v1348_v36, 0.0  ;;  %v3414_v36 = vld [vmem:[%s4988_s0 + $0x260] sm:$0xff] }
  0xa6   :  { %3285 = vmatmul.msk.bf16.gmra.mxu2 %vm939_vm2, %v3414_v36  ;;  %v3357_v36 = vld [vmem:[%s4988_s0 + $0x98] sm:$0xff] }
  0xa7   :  { %v3605_v39 = vpack.c.bf16 %v1983_v38, %v1982_v37 }
  0xa9   :  { %v3713_v32 = vpop.f32.mrf.mxu3 }
  0xaa   :  { %v1350_v43 = vpop.f32.mrf.mxu0  ;;  %4997 = vst [vmem:[#allocation4_spill] sm:$0xff] %v3713_v32 }
  0xab   :  { %v1351_v44 = vadd.f32 %v3584_v23, %v1350_v43 }
  0xad   :  { %3219 = vmatmul.msk.bf16.gmra.mxu0 %vm939_vm2, %v3348_v41  ;;  %v1984_v47 = vmax.f32 %v1351_v44, 0.0  ;;  %v3445_v41 = vld [vmem:[%s4988_s0 + $0x358] sm:$0xff] }
  0xae   :  { %3316 = vmatmul.msk.bf16.gmra.mxu3 %vm939_vm2, %v3445_v41 }
  0xb1   :  { %v3733_v50 = vpop.f32.mrf.mxu3 }
  0xb2   :  { %v1352_v45 = vpop.f32.mrf.mxu0 }
  0xb3   :  { %v1353_v46 = vadd.f32 %v3584_v23, %v1352_v45 }
  0xb5   :  { %v1985_v48 = vmax.f32 %v1353_v46, 0.0 }
  0xb6   :  { %3286 = vmatmul.msk.bf16.gmra.mxu2 %vm939_vm2, %v3415_v1  ;;  %v1676_v1 = vadd.f32 %v3584_v23, %v3699_v19  ;;  %v3359_v19 = vld [vmem:[%s4988_s0 + $0xa8] sm:$0xff] }
  0xb7   :  { %v3621_v49 = vpack.c.bf16 %v1985_v48, %v1984_v47  ;;  %v3731_v48 = vpop.f32.mrf.mxu2 }
  0xba   :  { %v1355_v53 = vpop.f32.mrf.mxu0 }
  0xbb   :  { %v1356_v54 = vadd.f32 %v3584_v23, %v1355_v53 }
  0xbd   :  { %3220 = vmatmul.msk.bf16.gmra.mxu0 %vm939_vm2, %v3349_v51  ;;  %v1986_v57 = vmax.f32 %v1356_v54, 0.0 }
  0xbe   :  { %3317 = vmatmul.msk.bf16.gmra.mxu3 %vm939_vm2, %v3446_v3  ;;  %v3386_v3 = vld [vmem:[%s4988_s0 + $0x180] sm:$0xff] }
  0xbf   :  { %v3740_v62 = vpop.f32.mrf.mxu2 }
  0xc2   :  { %v1357_v55 = vpop.f32.mrf.mxu0 }
  0xc3   :  { %v1358_v56 = vadd.f32 %v3584_v23, %v1357_v55 }
  0xc5   :  { %v1987_v58 = vmax.f32 %v1358_v56, 0.0 }
  0xc7   :  { %v3637_v59 = vpack.c.bf16 %v1987_v58, %v1986_v57  ;;  %v3382_v58 = vld [vmem:[%s4988_s0 + $0x160] sm:$0xff] }
  0xc8   :  { %3253 = vmatmul.msk.bf16.gmra.mxu1 %vm939_vm2, %v3382_v58 }
  0xca   :  { %v1360_v63 = vpop.f32.mrf.mxu0 }
  0xcb   :  { %v1361_v46 = vadd.f32 %v3584_v23, %v1360_v63  ;;  %v3743_v63 = vpop.f32.mrf.mxu3 }
  0xcd   :  { %3221 = vmatmul.msk.bf16.gmra.mxu0 %vm939_vm2, %v3350_v61  ;;  %v1988_v53 = vmax.f32 %v1361_v46, 0.0 }
  0xd2   :  { %v1362_v0 = vpop.f32.mrf.mxu0 }
  0xd3   :  { %v1363_v43 = vadd.f32 %v3584_v23, %v1362_v0 }
  0xd5   :  { %v1989_v51 = vmax.f32 %v1363_v43, 0.0 }
  0xd7   :  { %v2248_v57 = vpack.c.bf16 %v1989_v51, %v1988_v53 }
  0xd8   :  { %3254 = vmatmul.msk.bf16.gmra.mxu1 %vm939_vm2, %v3383_v9  ;;  %v3419_v9 = vld [vmem:[%s4988_s0 + $0x288] sm:$0xff] }
  0xda   :  { %v1365_v4 = vpop.f32.mrf.mxu0 }
  0xdb   :  { %v1366_v37 = vadd.f32 %v3584_v23, %v1365_v4 }
  0xdd   :  { %3222 = vmatmul.msk.bf16.gmra.mxu0 %vm939_vm2, %v3351_v2  ;;  %v1990_v47 = vmax.f32 %v1366_v37, 0.0  ;;  %v3355_v2 = vld [vmem:[%s4988_s0 + $0x88] sm:$0xff]  ;;  %v3448_v37 = vld [vmem:[%s4988_s0 + $0x370] sm:$0xff] }
  0xe2   :  { %v1367_v5 = vpop.f32.mrf.mxu0 }
  0xe3   :  { %v1368_v33 = vadd.f32 %v3584_v23, %v1367_v5  ;;  %v3761_v5 = vpop.f32.mrf.mxu2 }
  0xe5   :  { %v1991_v44 = vmax.f32 %v1368_v33, 0.0 }
  0xe7   :  { %v2249_v52 = vpack.c.bf16 %v1991_v44, %v1990_v47 }
  0xe8   :  { %3255 = vmatmul.msk.bf16.gmra.mxu1 %vm939_vm2, %v3384_v26 }
  0xea   :  { %v1370_v10 = vpop.f32.mrf.mxu0 }
  0xeb   :  { %v1371_v27 = vadd.f32 %v3584_v23, %v1370_v10 }
  0xed   :  { %3223 = vmatmul.msk.bf16.gmra.mxu0 %vm939_vm2, %v3352_v8  ;;  %v1992_v38 = vmax.f32 %v1371_v27, 0.0 }
  0xf2   :  { %v1372_v12 = vpop.f32.mrf.mxu0 }
  0xf3   :  { %v1373_v24 = vadd.f32 %v3584_v23, %v1372_v12 }
  0xf5   :  { %v1993_v34 = vmax.f32 %v1373_v24, 0.0 }
  0xf7   :  { %v2250_v45 = vpack.c.bf16 %v1993_v34, %v1992_v38 }
  0xfa   :  { %v1375_v18 = vpop.f32.mrf.mxu0 }
  0xfb   :  { %v1376_v21 = vadd.f32 %v3584_v23, %v1375_v18 }
  0xfd   :  { %3224 = vmatmul.msk.bf16.gmra.mxu0 %vm939_vm2, %v3353_v16  ;;  %v1994_v28 = vmax.f32 %v1376_v21, 0.0  ;;  %v3356_v16 = vld [vmem:[%s4988_s0 + $0x90] sm:$0xff] }
 0x102   :  { %v1377_v22 = vpop.f32.mrf.mxu0 }
 0x103   :  { %v1378_v25 = vadd.f32 %v3584_v23, %v1377_v22 }
 0x105   :  { %v1995_v30 = vmax.f32 %v1378_v25, 0.0 }
 0x107   :  { %v2251_v35 = vpack.c.bf16 %v1995_v30, %v1994_v28 }
 0x109   :  { %2428 = vmatpush.bf16.msrb.mxu1 %v2251_v35  ;;  %v3417_v35 = vld [vmem:[%s4988_s0 + $0x278] sm:$0xff] }
 0x10a   :  { %v1380_v42 = vpop.f32.mrf.mxu0 }
 0x10b   :  { %v1381_v54 = vadd.f32 %v3584_v23, %v1380_v42 }
 0x10d   :  { %3225 = vmatmul.msk.bf16.gmra.mxu0 %vm939_vm2, %v3354_v40  ;;  %2429 = vmatpush.bf16.msrb.mxu1 %v2250_v45  ;;  %v1996_v60 = vmax.f32 %v1381_v54, 0.0  ;;  %v3385_v45 = vld [vmem:[%s4988_s0 + $0x178] sm:$0xff]  ;;  %v3418_v54 = vld [vmem:[%s4988_s0 + $0x280] sm:$0xff] }
 0x10e   :  { %3256 = vmatmul.msk.bf16.gmra.mxu1 %vm939_vm2, %v3385_v45  ;;  %v1686_v45 = vadd.f32 %v3584_v23, %v3761_v5  ;;  %v3421_v5 = vld [vmem:[%s4988_s0 + $0x298] sm:$0xff] }
 0x111   :  { %2430 = vmatpush.bf16.msrb.mxu1 %v2249_v52 }
 0x112   :  { %v1382_v55 = vpop.f32.mrf.mxu0 }
 0x113   :  { %v1383_v56 = vadd.f32 %v3584_v23, %v1382_v55  ;;  %v3358_v55 = vld [vmem:[%s4988_s0 + $0xa0] sm:$0xff] }
 0x115   :  { %v1997_v61 = vmax.f32 %v1383_v56, 0.0  ;;  %2431 = vmatpush.bf16.msrb.mxu1 %v2248_v57  ;;  %v3449_v56 = vld [vmem:[%s4988_s0 + $0x378] sm:$0xff] }
 0x117   :  { %v3745_v0 = vpack.c.bf16 %v1997_v61, %v1996_v60 }
 0x119   :  { %2432 = vmatpush.bf16.msrb.mxu1 %v3637_v59  ;;  %v3763_v59 = vpop.f32.mrf.mxu3 }
 0x11a   :  { %v1385_v4 = vpop.f32.mrf.mxu0 }
 0x11b   :  { %v1386_v6 = vadd.f32 %v3584_v23, %v1385_v4 }
 0x11d   :  { %3226 = vmatmul.msk.bf16.gmra.mxu0 %vm939_vm2, %v3355_v2  ;;  %2433 = vmatpush.bf16.msrb.mxu1 %v3621_v49  ;;  %v1998_v10 = vmax.f32 %v1386_v6, 0.0  ;;  %v3772_v49 = vpop.f32.mrf.mxu2  ;;  %v1678_v2 = vadd.f32 %v3584_v23, %v3710_v31  ;;  %v3450_v31 = vld [vmem:[%s4988_s0 + $0x380] sm:$0xff] }
 0x11e   :  { %3257 = vmatmul.msk.bf16.gmra.mxu1 %vm939_vm2, %v3386_v3  ;;  %v3452_v3 = vld [vmem:[%s4988_s0 + $0x390] sm:$0xff] }
 0x121   :  { %2434 = vmatpush.bf16.msrb.mxu1 %v3605_v39  ;;  %v3775_v13 = vpop.f32.mrf.mxu3  ;;  %v3416_v39 = vld [vmem:[%s4988_s0 + $0x270] sm:$0xff] }
 0x122   :  { %v1387_v7 = vpop.f32.mrf.mxu0  ;;  %3287 = vmatmul.msk.bf16.gmra.mxu2 %vm939_vm2, %v3416_v39 }
 0x123   :  { %v1388_v8 = vadd.f32 %v3584_v23, %v1387_v7  ;;  %v2114_v7 = vmax.f32 %v1676_v1, 0.0  ;;  %v2118_v1 = vmax.f32 %v1686_v45, 0.0 }
 0x125   :  { %v1999_v12 = vmax.f32 %v1388_v8, 0.0  ;;  %2435 = vmatpush.bf16.msrb.mxu1 %v3589_v29  ;;  %v3447_v29 = vld [vmem:[%s4988_s0 + $0x368] sm:$0xff]  ;;  %v3791_v18 = vpop.f32.mrf.mxu2  ;;  %v2115_v8 = vmax.f32 %v1678_v2, 0.0 }
 0x126   :  { %3318 = vmatmul.msk.bf16.gmra.mxu3 %vm939_vm2, %v3447_v29  ;;  %v1691_v45 = vadd.f32 %v3584_v23, %v3791_v18 }
 0x127   :  { %v3777_v15 = vpack.c.bf16 %v1999_v12, %v1998_v10  ;;  %v3880_v12 = vpack.c.bf16 %v2115_v8, %v2114_v7 }
 0x129   :  { %v3793_v21 = vpop.f32.mrf.mxu3  ;;  %4998 = vst [vmem:[#allocation5_spill] sm:$0xff] %v3880_v12 }
 0x12a   :  { %v1390_v17 = vpop.f32.mrf.mxu0 }
 0x12b   :  { %v1391_v22 = vadd.f32 %v3584_v23, %v1390_v17  ;;  %v1681_v17 = vadd.f32 %v3584_v23, %v3731_v48  ;;  %v3360_v48 = vld [vmem:[%s4988_s0 + $0xb0] sm:$0xff] }
 0x12d   :  { %3227 = vmatmul.msk.bf16.gmra.mxu0 %vm939_vm2, %v3356_v16  ;;  %v2000_v27 = vmax.f32 %v1391_v22, 0.0  ;;  %v3800_v30 = vpop.f32.mrf.mxu2  ;;  %v1683_v22 = vadd.f32 %v3584_v23, %v3740_v62  ;;  %v3451_v62 = vld [vmem:[%s4988_s0 + $0x388] sm:$0xff] }
 0x131   :  { %v3803_v33 = vpop.f32.mrf.mxu3 }
 0x132   :  { %v1392_v24 = vpop.f32.mrf.mxu0  ;;  %3288 = vmatmul.msk.bf16.gmra.mxu2 %vm939_vm2, %v3417_v35  ;;  %v3420_v35 = vld [vmem:[%s4988_s0 + $0x290] sm:$0xff] }
 0x133   :  { %v1393_v25 = vadd.f32 %v3584_v23, %v1392_v24  ;;  %v3387_v24 = vld [vmem:[%s4988_s0 + $0x188] sm:$0xff] }
 0x134   :  { %3258 = vmatmul.msk.bf16.gmra.mxu1 %vm939_vm2, %v3387_v24 }
 0x135   :  { %v2001_v28 = vmax.f32 %v1393_v25, 0.0  ;;  %v3819_v40 = vpop.f32.mrf.mxu2 }
 0x136   :  { %3319 = vmatmul.msk.bf16.gmra.mxu3 %vm939_vm2, %v3448_v37 }
 0x137   :  { %v3805_v34 = vpack.c.bf16 %v2001_v28, %v2000_v27  ;;  %v2116_v27 = vmax.f32 %v1681_v17, 0.0  ;;  %v2117_v28 = vmax.f32 %v1683_v22, 0.0 }
 0x139   :  { %v3821_v41 = vpop.f32.mrf.mxu3  ;;  %v3910_v37 = vpack.c.bf16 %v2117_v28, %v2116_v27 }
 0x13a   :  { %v1395_v38 = vpop.f32.mrf.mxu0 }
 0x13b   :  { %v1396_v42 = vadd.f32 %v3584_v23, %v1395_v38  ;;  %5001 = vst [vmem:[#allocation8_spill] sm:$0xff] %v3910_v37  ;;  %v1545_v38 = vpop.f32.mrf.mxu1 }
 0x13c   :  { %v1546_v8 = vadd.f32 %v3584_v23, %v1545_v38 }
 0x13d   :  { %3228 = vmatmul.msk.bf16.gmra.mxu0 %vm939_vm2, %v3357_v36  ;;  %v2002_v46 = vmax.f32 %v1396_v42, 0.0  ;;  %v3828_v51 = vpop.f32.mrf.mxu2 }
 0x13e   :  { %v2062_v22 = vmax.f32 %v1546_v8, 0.0 }
 0x141   :  { %v3831_v52 = vpop.f32.mrf.mxu3 }
 0x142   :  { %v1397_v43 = vpop.f32.mrf.mxu0  ;;  %3289 = vmatmul.msk.bf16.gmra.mxu2 %vm939_vm2, %v3418_v54 }
 0x143   :  { %v1398_v44 = vadd.f32 %v3584_v23, %v1397_v43  ;;  %v1547_v54 = vpop.f32.mrf.mxu1 }
 0x145   :  { %v2003_v47 = vmax.f32 %v1398_v44, 0.0  ;;  %v3849_v58 = vpop.f32.mrf.mxu2 }
 0x146   :  { %3320 = vmatmul.msk.bf16.gmra.mxu3 %vm939_vm2, %v3449_v56 }
 0x147   :  { %v3833_v53 = vpack.c.bf16 %v2003_v47, %v2002_v46  ;;  %v1688_v46 = vadd.f32 %v3584_v23, %v3772_v49  ;;  %v3388_v47 = vld [vmem:[%s4988_s0 + $0x190] sm:$0xff]  ;;  %v3361_v49 = vld [vmem:[%s4988_s0 + $0xb8] sm:$0xff] }
 0x148   :  { %3259 = vmatmul.msk.bf16.gmra.mxu1 %vm939_vm2, %v3388_v47  ;;  %v3389_v47 = vld [vmem:[%s4988_s0 + $0x198] sm:$0xff] }
 0x149   :  { %v3851_v60 = vpop.f32.mrf.mxu3  ;;  %v2119_v2 = vmax.f32 %v1688_v46, 0.0  ;;  %v1693_v46 = vadd.f32 %v3584_v23, %v3800_v30  ;;  %v2120_v30 = vmax.f32 %v1691_v45, 0.0 }
 0x14a   :  { %v3844_v57 = vpop.f32.mrf.mxu0 }
 0x14b   :  { %v2121_v8 = vmax.f32 %v1693_v46, 0.0 }
 0x14d   :  { %3229 = vmatmul.msk.bf16.gmra.mxu0 %vm939_vm2, %v3358_v55  ;;  %v3862_v4 = vpop.f32.mrf.mxu2 }
 0x151   :  { %v3865_v6 = vpop.f32.mrf.mxu3 }
 0x152   :  { %v3853_v61 = vpop.f32.mrf.mxu0  ;;  %3290 = vmatmul.msk.bf16.gmra.mxu2 %vm939_vm2, %v3419_v9  ;;  %v1548_v9 = vadd.f32 %v3584_v23, %v1547_v54 }
 0x154   :  { %v2063_v24 = vmax.f32 %v1548_v9, 0.0  ;;  %v3422_v9 = vld [vmem:[%s4988_s0 + $0x2a0] sm:$0xff] }
 0x155   :  { %v3883_v39 = vpop.f32.mrf.mxu2 }
 0x156   :  { %3321 = vmatmul.msk.bf16.gmra.mxu3 %vm939_vm2, %v3450_v31  ;;  %v1550_v31 = vpop.f32.mrf.mxu1 }
 0x158   :  { %3260 = vmatmul.msk.bf16.gmra.mxu1 %vm939_vm2, %v3389_v47  ;;  %v3987_v47 = vpack.c.bf16 %v2121_v8, %v2120_v30 }
 0x159   :  { %v3885_v16 = vpop.f32.mrf.mxu3 }
 0x15a   :  { %v3876_v10 = vpop.f32.mrf.mxu0  ;;  %4999 = vst [vmem:[#allocation6_spill] sm:$0xff] %v3885_v16 }
 0x15b   :  { %5007 = vst [vmem:[#allocation14_spill] sm:$0xff] %v3987_v47 }
 0x15d   :  { %3230 = vmatmul.msk.bf16.gmra.mxu0 %vm939_vm2, %v3359_v19  ;;  %v3894_v25 = vpop.f32.mrf.mxu2  ;;  %v3942_v19 = vpack.c.bf16 %v2119_v2, %v2118_v1 }
 0x15f   :  { %5004 = vst [vmem:[#allocation11_spill] sm:$0xff] %v3942_v19 }
 0x161   :  { %v3897_v26 = vpop.f32.mrf.mxu3 }
 0x162   :  { %v1407_v29 = vpop.f32.mrf.mxu0  ;;  %5000 = vst [vmem:[#allocation7_spill] sm:$0xff] %v3897_v26  ;;  %3291 = vmatmul.msk.bf16.gmra.mxu2 %vm939_vm2, %v3420_v35 }
 0x165   :  { %v3913_v42 = vpop.f32.mrf.mxu2 }
 0x166   :  { %3322 = vmatmul.msk.bf16.gmra.mxu3 %vm939_vm2, %v3451_v62 }
 0x169   :  { %v3915_v43 = vpop.f32.mrf.mxu3 }
 0x16a   :  { %v1410_v36 = vpop.f32.mrf.mxu0  ;;  %5002 = vst [vmem:[#allocation9_spill] sm:$0xff] %v3915_v43 }
 0x16b   :  { %v1411_v54 = vadd.f32 %v3584_v23, %v1410_v36  ;;  %v1406_v36 = vadd.f32 %v3584_v23, %v3876_v10  ;;  %v1403_v10 = vadd.f32 %v3584_v23, %v3853_v61 }
 0x16d   :  { %3231 = vmatmul.msk.bf16.gmra.mxu0 %vm939_vm2, %v3360_v48  ;;  %v3924_v55 = vpop.f32.mrf.mxu2  ;;  %v3950_v48 = vpack.c.bf16 %v2063_v24, %v2062_v22  ;;  %v2008_v22 = vmax.f32 %v1411_v54, 0.0  ;;  %v1696_v24 = vadd.f32 %v3584_v23, %v3819_v40  ;;  %v1401_v40 = vadd.f32 %v3584_v23, %v3844_v57 }
 0x16e   :  { %v2006_v54 = vmax.f32 %v1406_v36, 0.0 }
 0x171   :  { %v3927_v56 = vpop.f32.mrf.mxu3 }
 0x172   :  { %v1412_v44 = vpop.f32.mrf.mxu0  ;;  %5003 = vst [vmem:[#allocation10_spill] sm:$0xff] %v3927_v56  ;;  %3292 = vmatmul.msk.bf16.gmra.mxu2 %vm939_vm2, %v3421_v5  ;;  %v1552_v5 = vpop.f32.mrf.mxu1 }
 0x173   :  { %v1413_v62 = vadd.f32 %v3584_v23, %v1412_v44  ;;  %v1408_v44 = vadd.f32 %v3584_v23, %v1407_v29  ;;  %v3362_v29 = vld [vmem:[%s4988_s0 + $0xc0] sm:$0xff] }
 0x175   :  { %v3945_v17 = vpop.f32.mrf.mxu2  ;;  %v2009_v18 = vmax.f32 %v1413_v62, 0.0  ;;  %v1551_v62 = vadd.f32 %v3584_v23, %v1550_v31  ;;  %v2007_v45 = vmax.f32 %v1408_v44, 0.0  ;;  %v2122_v31 = vmax.f32 %v1696_v24, 0.0 }
 0x176   :  { %3323 = vmatmul.msk.bf16.gmra.mxu3 %vm939_vm2, %v3452_v3 }
 0x177   :  { %v2258_v46 = vpack.c.bf16 %v2009_v18, %v2008_v22  ;;  %v2064_v61 = vmax.f32 %v1551_v62, 0.0  ;;  %v2257_v30 = vpack.c.bf16 %v2007_v45, %v2006_v54  ;;  %v3363_v54 = vld [vmem:[%s4988_s0 + $0xc8] sm:$0xff] }
 0x179   :  { %v3947_v27 = vpop.f32.mrf.mxu3 }
 0x17a   :  { %v1415_v7 = vpop.f32.mrf.mxu0  ;;  %5005 = vst [vmem:[#allocation12_spill] sm:$0xff] %v3947_v27 }
 0x17b   :  { %v1416_v28 = vadd.f32 %v3584_v23, %v1415_v7 }
 0x17d   :  { %3232 = vmatmul.msk.bf16.gmra.mxu0 %vm939_vm2, %v3361_v49  ;;  %v2010_v1 = vmax.f32 %v1416_v28, 0.0  ;;  %v3962_v49 = vpop.f32.mrf.mxu2  ;;  %v3453_v28 = vld [vmem:[%s4988_s0 + $0x398] sm:$0xff] }
 0x181   :  { %v3966_v3 = vpop.f32.mrf.mxu3 }
 0x182   :  { %v1417_v35 = vpop.f32.mrf.mxu0  ;;  %5006 = vst [vmem:[#allocation13_spill] sm:$0xff] %v3966_v3  ;;  %3293 = vmatmul.msk.bf16.gmra.mxu2 %vm939_vm2, %v3422_v9  ;;  %v2004_v9 = vmax.f32 %v1401_v40, 0.0  ;;  %v3423_v40 = vld [vmem:[%s4988_s0 + $0x2a8] sm:$0xff]  ;;  %v1716_v3 = vadd.f32 %v3584_v23, %v3945_v17 }
 0x183   :  { %v1418_v38 = vadd.f32 %v3584_v23, %v1417_v35  ;;  %v3427_v17 = vld [vmem:[%s4988_s0 + $0x2c8] sm:$0xff] }
 0x184   :  { %v2130_v27 = vmax.f32 %v1716_v3, 0.0 }
 0x185   :  { %v2011_v2 = vmax.f32 %v1418_v38, 0.0  ;;  %v1553_v38 = vadd.f32 %v3584_v23, %v1552_v5  ;;  %v3994_v5 = vpop.f32.mrf.mxu2 }
 0x186   :  { %3324 = vmatmul.msk.bf16.gmra.mxu3 %vm939_vm2, %v3453_v28  ;;  %v3390_v28 = vld [vmem:[%s4988_s0 + $0x1a0] sm:$0xff] }
 0x187   :  { %v2259_v7 = vpack.c.bf16 %v2011_v2, %v2010_v1  ;;  %v1555_v1 = vpop.f32.mrf.mxu1  ;;  %v1698_v2 = vadd.f32 %v3584_v23, %v3828_v51  ;;  %v2065_v44 = vmax.f32 %v1553_v38, 0.0  ;;  %3261 = vmatmul.msk.bf16.gmra.mxu1 %vm939_vm2, %v3390_v28  ;;  %v3391_v28 = vld [vmem:[%s4988_s0 + $0x1a8] sm:$0xff] }
 0x189   :  { %2441 = vmatpush.bf16.msrb.mxu2 %v2259_v7  ;;  %v3996_v18 = vpop.f32.mrf.mxu3  ;;  %v2005_v7 = vmax.f32 %v1403_v10, 0.0  ;;  %v2123_v8 = vmax.f32 %v1698_v2, 0.0 }
 0x18a   :  { %v1420_v35 = vpop.f32.mrf.mxu0  ;;  %5008 = vst [vmem:[#allocation15_spill] sm:$0xff] %v3996_v18  ;;  %v3458_v18 = vld [vmem:[%s4988_s0 + $0x3c0] sm:$0xff] }
 0x18b   :  { %v1421_v57 = vadd.f32 %v3584_v23, %v1420_v35  ;;  %v3999_v36 = vpack.c.bf16 %v2123_v8, %v2122_v31  ;;  %v2256_v24 = vpack.c.bf16 %v2005_v7, %v2004_v9  ;;  %v3454_v31 = vld [vmem:[%s4988_s0 + $0x3a0] sm:$0xff] }
 0x18d   :  { %3233 = vmatmul.msk.bf16.gmra.mxu0 %vm939_vm2, %v3362_v29  ;;  %2442 = vmatpush.bf16.msrb.mxu2 %v2258_v46  ;;  %5009 = vst [vmem:[#allocation16_spill] sm:$0xff] %v3999_v36  ;;  %v4001_v29 = vpack.c.bf16 %v2065_v44, %v2064_v61  ;;  %v2012_v62 = vmax.f32 %v1421_v57, 0.0  ;;  %v4007_v45 = vpop.f32.mrf.mxu2  ;;  %v1556_v61 = vadd.f32 %v3584_v23, %v1555_v1 }
 0x18f   :  { %v1557_v10 = vpop.f32.mrf.mxu1 }
 0x190   :  { %v1558_v44 = vadd.f32 %v3584_v23, %v1557_v10 }
 0x191   :  { %2443 = vmatpush.bf16.msrb.mxu2 %v2257_v30  ;;  %v4010_v35 = vpop.f32.mrf.mxu3  ;;  %v2066_v30 = vmax.f32 %v1556_v61, 0.0 }
 0x192   :  { %v1422_v22 = vpop.f32.mrf.mxu0  ;;  %5010 = vst [vmem:[#allocation17_spill] sm:$0xff] %v4010_v35  ;;  %3294 = vmatmul.msk.bf16.gmra.mxu2 %vm939_vm2, %v3423_v40  ;;  %v2067_v8 = vmax.f32 %v1558_v44, 0.0 }
 0x193   :  { %v1423_v51 = vadd.f32 %v3584_v23, %v1422_v22 }
 0x194   :  { %v4036_v22 = vpack.c.bf16 %v2067_v8, %v2066_v30 }
 0x195   :  { %v2013_v38 = vmax.f32 %v1423_v51, 0.0  ;;  %2444 = vmatpush.bf16.msrb.mxu2 %v2256_v24  ;;  %v4030_v7 = vpop.f32.mrf.mxu2  ;;  %v1701_v24 = vadd.f32 %v3584_v23, %v3849_v58 }
 0x196   :  { %3325 = vmatmul.msk.bf16.gmra.mxu3 %vm939_vm2, %v3454_v31 }
 0x197   :  { %v4012_v46 = vpack.c.bf16 %v2013_v38, %v2012_v62  ;;  %3262 = vmatmul.msk.bf16.gmra.mxu1 %vm939_vm2, %v3391_v28 }
 0x199   :  { %2445 = vmatpush.bf16.msrb.mxu2 %v3833_v53  ;;  %v1560_v53 = vpop.f32.mrf.mxu1  ;;  %v4032_v9 = vpop.f32.mrf.mxu3 }
 0x19a   :  { %v1425_v2 = vpop.f32.mrf.mxu0  ;;  %5011 = vst [vmem:[#allocation18_spill] sm:$0xff] %v4032_v9  ;;  %v1561_v44 = vadd.f32 %v3584_v23, %v1560_v53 }
 0x19b   :  { %v1426_v57 = vadd.f32 %v3584_v23, %v1425_v2  ;;  %v3364_v2 = vld [vmem:[%s4988_s0 + $0xd0] sm:$0xff] }
 0x19d   :  { %3234 = vmatmul.msk.bf16.gmra.mxu0 %vm939_vm2, %v3363_v54  ;;  %2446 = vmatpush.bf16.msrb.mxu2 %v3805_v34  ;;  %v1703_v34 = vadd.f32 %v3584_v23, %v3862_v4  ;;  %v2014_v62 = vmax.f32 %v1426_v57, 0.0  ;;  %v4047_v10 = vpop.f32.mrf.mxu2  ;;  %v2124_v54 = vmax.f32 %v1701_v24, 0.0  ;;  %v3424_v4 = vld [vmem:[%s4988_s0 + $0x2b0] sm:$0xff] }
 0x19f   :  { %v2125_v58 = vmax.f32 %v1703_v34, 0.0 }
 0x1a1   :  { %2447 = vmatpush.bf16.msrb.mxu2 %v3777_v15  ;;  %v1562_v15 = vpop.f32.mrf.mxu1  ;;  %v4050_v40 = vpop.f32.mrf.mxu3  ;;  %v4067_v8 = vpack.c.bf16 %v2125_v58, %v2124_v54  ;;  %v1708_v54 = vadd.f32 %v3584_v23, %v3894_v25  ;;  %v3392_v58 = vld [vmem:[%s4988_s0 + $0x1b0] sm:$0xff]  ;;  %v3365_v25 = vld [vmem:[%s4988_s0 + $0xd8] sm:$0xff] }
 0x1a2   :  { %v1427_v1 = vpop.f32.mrf.mxu0  ;;  %5012 = vst [vmem:[#allocation19_spill] sm:$0xff] %v4050_v40  ;;  %v1563_v30 = vadd.f32 %v3584_v23, %v1562_v15  ;;  %3295 = vmatmul.msk.bf16.gmra.mxu2 %vm939_vm2, %v3424_v4  ;;  %v1706_v15 = vadd.f32 %v3584_v23, %v3883_v39  ;;  %v3425_v39 = vld [vmem:[%s4988_s0 + $0x2b8] sm:$0xff] }
 0x1a3   :  { %v1428_v51 = vadd.f32 %v3584_v23, %v1427_v1 }
 0x1a4   :  { %v2069_v24 = vmax.f32 %v1563_v30, 0.0  ;;  %v2126_v30 = vmax.f32 %v1706_v15, 0.0 }
 0x1a5   :  { %v2015_v38 = vmax.f32 %v1428_v51, 0.0  ;;  %2448 = vmatpush.bf16.msrb.mxu2 %v3745_v0  ;;  %v3455_v0 = vld [vmem:[%s4988_s0 + $0x3a8] sm:$0xff]  ;;  %v4070_v1 = vpop.f32.mrf.mxu2  ;;  %v2068_v51 = vmax.f32 %v1561_v44, 0.0 }
 0x1a6   :  { %3326 = vmatmul.msk.bf16.gmra.mxu3 %vm939_vm2, %v3455_v0 }
 0x1a7   :  { %v4052_v31 = vpack.c.bf16 %v2015_v38, %v2014_v62  ;;  %v4075_v62 = vpack.c.bf16 %v2069_v24, %v2068_v51  ;;  %3263 = vmatmul.msk.bf16.gmra.mxu1 %vm939_vm2, %v3392_v58  ;;  %v2127_v51 = vmax.f32 %v1708_v54, 0.0 }
 0x1a9   :  { %v1565_v57 = vpop.f32.mrf.mxu1  ;;  %v4072_v34 = vpop.f32.mrf.mxu3  ;;  %v4105_v54 = vpack.c.bf16 %v2127_v51, %v2126_v30  ;;  %v1711_v30 = vadd.f32 %v3584_v23, %v3913_v42  ;;  %v1713_v51 = vadd.f32 %v3584_v23, %v3924_v55  ;;  %v3426_v55 = vld [vmem:[%s4988_s0 + $0x2c0] sm:$0xff] }
 0x1aa   :  { %v1430_v61 = vpop.f32.mrf.mxu0  ;;  %5013 = vst [vmem:[#allocation20_spill] sm:$0xff] %v4072_v34  ;;  %v1721_v34 = vadd.f32 %v3584_v23, %v3994_v5  ;;  %v3428_v5 = vld [vmem:[%s4988_s0 + $0x2d0] sm:$0xff] }
 0x1ab   :  { %v1431_v28 = vadd.f32 %v3584_v23, %v1430_v61 }
 0x1ad   :  { %3235 = vmatmul.msk.bf16.gmra.mxu0 %vm939_vm2, %v3364_v2  ;;  %v2016_v4 = vmax.f32 %v1431_v28, 0.0  ;;  %v4085_v44 = vpop.f32.mrf.mxu2  ;;  %v3456_v28 = vld [vmem:[%s4988_s0 + $0x3b0] sm:$0xff] }
 0x1b1   :  { %v1567_v0 = vpop.f32.mrf.mxu1  ;;  %v4088_v61 = vpop.f32.mrf.mxu3 }
 0x1b2   :  { %v1432_v53 = vpop.f32.mrf.mxu0  ;;  %5014 = vst [vmem:[#allocation21_spill] sm:$0xff] %v4088_v61  ;;  %v1568_v15 = vadd.f32 %v3584_v23, %v1567_v0  ;;  %3296 = vmatmul.msk.bf16.gmra.mxu2 %vm939_vm2, %v3425_v39 }
 0x1b3   :  { %v1433_v38 = vadd.f32 %v3584_v23, %v1432_v53 }
 0x1b4   :  { %v2071_v26 = vmax.f32 %v1568_v15, 0.0 }
 0x1b5   :  { %v2017_v2 = vmax.f32 %v1433_v38, 0.0  ;;  %v1566_v38 = vadd.f32 %v3584_v23, %v1565_v57 }
 0x1b6   :  { %3327 = vmatmul.msk.bf16.gmra.mxu3 %vm939_vm2, %v3456_v28 }
 0x1b7   :  { %v4090_v24 = vpack.c.bf16 %v2017_v2, %v2016_v4  ;;  %v4110_v4 = vpop.f32.mrf.mxu2  ;;  %v2070_v2 = vmax.f32 %v1566_v38, 0.0 }
 0x1b9   :  { %v4108_v58 = vpop.f32.mrf.mxu1  ;;  %v4112_v16 = vpop.f32.mrf.mxu3  ;;  %v4115_v0 = vpack.c.bf16 %v2071_v26, %v2070_v2  ;;  %v2129_v2 = vmax.f32 %v1713_v51, 0.0 }
 0x1ba   :  { %v1435_v53 = vpop.f32.mrf.mxu0  ;;  %5015 = vst [vmem:[#allocation22_spill] sm:$0xff] %v4112_v16  ;;  %v3459_v16 = vld [vmem:[%s4988_s0 + $0x3c8] sm:$0xff] }
 0x1bb   :  { %v1436_v57 = vadd.f32 %v3584_v23, %v1435_v53 }
 0x1bd   :  { %3236 = vmatmul.msk.bf16.gmra.mxu0 %vm939_vm2, %v3365_v25  ;;  %v3393_v25 = vld [vmem:[%s4988_s0 + $0x1b8] sm:$0xff]  ;;  %v2018_v28 = vmax.f32 %v1436_v57, 0.0  ;;  %v3366_v57 = vld [vmem:[%s4988_s0 + $0xe0] sm:$0xff] }
 0x1be   :  { %3264 = vmatmul.msk.bf16.gmra.mxu1 %vm939_vm2, %v3393_v25 }
 0x1bf   :  { %v4127_v53 = vpop.f32.mrf.mxu2 }
 0x1c1   :  { %v4125_v15 = vpop.f32.mrf.mxu1  ;;  %v4130_v26 = vpop.f32.mrf.mxu3 }
 0x1c2   :  { %v1437_v56 = vpop.f32.mrf.mxu0  ;;  %5016 = vst [vmem:[#allocation23_spill] sm:$0xff] %v4130_v26  ;;  %3297 = vmatmul.msk.bf16.gmra.mxu2 %vm939_vm2, %v3426_v55  ;;  %v1718_v55 = vadd.f32 %v3584_v23, %v3962_v49  ;;  %v3367_v49 = vld [vmem:[%s4988_s0 + $0xe8] sm:$0xff]  ;;  %v1723_v26 = vadd.f32 %v3584_v23, %v4007_v45  ;;  %v3368_v45 = vld [vmem:[%s4988_s0 + $0xf0] sm:$0xff] }
 0x1c3   :  { %v1438_v39 = vadd.f32 %v3584_v23, %v1437_v56  ;;  %v2128_v56 = vmax.f32 %v1711_v30, 0.0 }
 0x1c4   :  { %v2131_v35 = vmax.f32 %v1718_v55, 0.0 }
 0x1c5   :  { %v2019_v38 = vmax.f32 %v1438_v39, 0.0  ;;  %v3457_v39 = vld [vmem:[%s4988_s0 + $0x3b8] sm:$0xff]  ;;  %v4147_v30 = vpack.c.bf16 %v2129_v2, %v2128_v56  ;;  %v3394_v56 = vld [vmem:[%s4988_s0 + $0x1c0] sm:$0xff] }
 0x1c6   :  { %3328 = vmatmul.msk.bf16.gmra.mxu3 %vm939_vm2, %v3457_v39  ;;  %v4185_v3 = vpack.c.bf16 %v2131_v35, %v2130_v27  ;;  %v3395_v27 = vld [vmem:[%s4988_s0 + $0x1c8] sm:$0xff] }
 0x1c7   :  { %v4132_v42 = vpack.c.bf16 %v2019_v38, %v2018_v28  ;;  %v4152_v25 = vpop.f32.mrf.mxu2 }
 0x1c9   :  { %v4150_v51 = vpop.f32.mrf.mxu1  ;;  %v4154_v28 = vpop.f32.mrf.mxu3 }
 0x1ca   :  { %v4143_v43 = vpop.f32.mrf.mxu0  ;;  %5017 = vst [vmem:[#allocation24_spill] sm:$0xff] %v4154_v28 }
 0x1cd   :  { %3237 = vmatmul.msk.bf16.gmra.mxu0 %vm939_vm2, %v3366_v57 }
 0x1ce   :  { %3265 = vmatmul.msk.bf16.gmra.mxu1 %vm939_vm2, %v3394_v56 }
 0x1cf   :  { %v4167_v57 = vpop.f32.mrf.mxu2 }
 0x1d1   :  { %v4165_v2 = vpop.f32.mrf.mxu1  ;;  %v4170_v39 = vpop.f32.mrf.mxu3 }
 0x1d2   :  { %v4156_v38 = vpop.f32.mrf.mxu0  ;;  %5018 = vst [vmem:[#allocation25_spill] sm:$0xff] %v4170_v39  ;;  %3298 = vmatmul.msk.bf16.gmra.mxu2 %vm939_vm2, %v3427_v17 }
 0x1d6   :  { %3329 = vmatmul.msk.bf16.gmra.mxu3 %vm939_vm2, %v3458_v18 }
 0x1d7   :  { %v4188_v56 = vpop.f32.mrf.mxu2 }
 0x1d9   :  { %v1580_v55 = vpop.f32.mrf.mxu1  ;;  %v4190_v9 = vpop.f32.mrf.mxu3 }
 0x1da   :  { %v4181_v40 = vpop.f32.mrf.mxu0  ;;  %5019 = vst [vmem:[#allocation26_spill] sm:$0xff] %v4190_v9  ;;  %v2133_v9 = vmax.f32 %v1723_v26, 0.0  ;;  %v1581_v28 = vadd.f32 %v3584_v23, %v1580_v55  ;;  %v1726_v55 = vadd.f32 %v3584_v23, %v4030_v7  ;;  %v3369_v7 = vld [vmem:[%s4988_s0 + $0xf8] sm:$0xff] }
 0x1dc   :  { %v2076_v12 = vmax.f32 %v1581_v28, 0.0 }
 0x1dd   :  { %3238 = vmatmul.msk.bf16.gmra.mxu0 %vm939_vm2, %v3367_v49  ;;  %v2132_v49 = vmax.f32 %v1721_v34, 0.0 }
 0x1de   :  { %3266 = vmatmul.msk.bf16.gmra.mxu1 %vm939_vm2, %v3395_v27 }
 0x1df   :  { %v4201_v35 = vpop.f32.mrf.mxu2  ;;  %v4219_v34 = vpack.c.bf16 %v2133_v9, %v2132_v49  ;;  %v3396_v9 = vld [vmem:[%s4988_s0 + $0x1d0] sm:$0xff] }
 0x1e1   :  { %v1582_v18 = vpop.f32.mrf.mxu1  ;;  %v4204_v17 = vpop.f32.mrf.mxu3 }
 0x1e2   :  { %v4192_v61 = vpop.f32.mrf.mxu0  ;;  %5020 = vst [vmem:[#allocation27_spill] sm:$0xff] %v4204_v17  ;;  %v1583_v27 = vadd.f32 %v3584_v23, %v1582_v18  ;;  %3299 = vmatmul.msk.bf16.gmra.mxu2 %vm939_vm2, %v3428_v5  ;;  %v2134_v5 = vmax.f32 %v1726_v55, 0.0 }
 0x1e4   :  { %v2077_v37 = vmax.f32 %v1583_v27, 0.0 }
 0x1e6   :  { %3330 = vmatmul.msk.bf16.gmra.mxu3 %vm939_vm2, %v3459_v16  ;;  %v4226_v36 = vpack.c.bf16 %v2077_v37, %v2076_v12  ;;  %v1728_v16 = vadd.f32 %v3584_v23, %v4047_v10  ;;  %v3429_v37 = vld [vmem:[%s4988_s0 + $0x2d8] sm:$0xff]  ;;  %v3460_v10 = vld [vmem:[%s4988_s0 + $0x3d0] sm:$0xff] }
 0x1e7   :  { %v4222_v17 = vpop.f32.mrf.mxu2 }
 0x1e8   :  { %v2135_v12 = vmax.f32 %v1728_v16, 0.0 }
 0x1e9   :  { %v1585_v26 = vpop.f32.mrf.mxu1  ;;  %v4224_v19 = vpop.f32.mrf.mxu3 }
 0x1ea   :  { %v1450_v39 = vpop.f32.mrf.mxu0  ;;  %5021 = vst [vmem:[#allocation28_spill] sm:$0xff] %v4224_v19  ;;  %v1586_v27 = vadd.f32 %v3584_v23, %v1585_v26  ;;  %v4253_v55 = vpack.c.bf16 %v2135_v12, %v2134_v5  ;;  %v4263_v26 = vld [vmem:[%s4987_s2] ss:$0 sm:$0xff] }
 0x1ec   :  { %v2078_v19 = vmax.f32 %v1586_v27, 0.0  ;;  %v3397_v27 = vld [vmem:[%s4988_s0 + $0x1d8] sm:$0xff] }
 0x1ed   :  { %3239 = vmatmul.msk.bf16.gmra.mxu0 %vm939_vm2, %v3368_v45 }
 0x1ee   :  { %3267 = vmatmul.msk.bf16.gmra.mxu1 %vm939_vm2, %v3396_v9 }
 0x1ef   :  { %v4235_v49 = vpop.f32.mrf.mxu2 }
 0x1f1   :  { %v1587_v18 = vpop.f32.mrf.mxu1  ;;  %v4238_v28 = vpop.f32.mrf.mxu3 }
 0x1f2   :  { %v1452_v47 = vpop.f32.mrf.mxu0  ;;  %5022 = vst [vmem:[#allocation29_spill] sm:$0xff] %v4238_v28  ;;  %v1588_v9 = vadd.f32 %v3584_v23, %v1587_v18  ;;  %3300 = vmatmul.msk.bf16.gmra.mxu2 %vm939_vm2, %v3429_v37 }
 0x1f3   :  { %v1453_v5 = vadd.f32 %v4263_v26, %v1452_v47  ;;  %v1448_v47 = vadd.f32 %v4263_v26, %v4192_v61  ;;  %v3370_v61 = vld [vmem:[%s4988_s0 + $0x100] sm:$0xff] }
 0x1f4   :  { %v2079_v14 = vmax.f32 %v1588_v9, 0.0  ;;  %v1451_v9 = vadd.f32 %v4263_v26, %v1450_v39  ;;  %v3430_v39 = vld [vmem:[%s4988_s0 + $0x2e0] sm:$0xff] }
 0x1f6   :  { %3331 = vmatmul.msk.bf16.gmra.mxu3 %vm939_vm2, %v3460_v10  ;;  %v4266_v37 = vpack.c.bf16 %v2079_v14, %v2078_v19  ;;  %v1733_v10 = vadd.f32 %v4263_v26, %v4085_v44 }
 0x1f7   :  { %v4256_v28 = vpop.f32.mrf.mxu2 }
 0x1f8   :  { %5023 = vst [vmem:[#allocation30_spill] sm:$0xff] %v4256_v28  ;;  %v2137_v32 = vmax.f32 %v1733_v10, 0.0 }
 0x1f9   :  { %v1590_v16 = vpop.f32.mrf.mxu1  ;;  %v4258_v11 = vpop.f32.mrf.mxu3 }
 0x1fa   :  { %v1455_v45 = vpop.f32.mrf.mxu0  ;;  %5024 = vst [vmem:[#allocation31_spill] sm:$0xff] %v4258_v11 }
 0x1fb   :  { %v1456_v23 = vadd.f32 %v4263_v26, %v1455_v45 }
 0x1fd   :  { %3240 = vmatmul.msk.bf16.gmra.mxu0 %vm939_vm2, %v3369_v7  ;;  %v1731_v7 = vadd.f32 %v4263_v26, %v4070_v1  ;;  %v2026_v45 = vmax.f32 %v1456_v23, 0.0  ;;  %v1446_v23 = vadd.f32 %v4263_v26, %v4181_v40  ;;  %v1443_v40 = vadd.f32 %v4263_v26, %v4156_v38 }
 0x1fe   :  { %3268 = vmatmul.msk.bf16.gmra.mxu1 %vm939_vm2, %v3397_v27  ;;  %v1736_v27 = vadd.f32 %v4263_v26, %v4110_v4  ;;  %v1441_v4 = vadd.f32 %v4263_v26, %v4143_v43 }
 0x1ff   :  { %v4278_v19 = vpop.f32.mrf.mxu2  ;;  %v2136_v28 = vmax.f32 %v1731_v7, 0.0  ;;  %v1591_v7 = vadd.f32 %v4263_v26, %v1590_v16 }
 0x200   :  { %5025 = vst [vmem:[#allocation32_spill] sm:$0xff] %v4278_v19  ;;  %v2138_v16 = vmax.f32 %v1736_v27, 0.0 }
 0x201   :  { %v1592_v14 = vpop.f32.mrf.mxu1  ;;  %v4283_v1 = vpop.f32.mrf.mxu3  ;;  %v2080_v38 = vmax.f32 %v1591_v7, 0.0  ;;  %v3398_v7 = vld [vmem:[%s4988_s0 + $0x1e0] sm:$0xff] }
 0x202   :  { %v1457_v18 = vpop.f32.mrf.mxu0  ;;  %5026 = vst [vmem:[#allocation33_spill] sm:$0xff] %v4283_v1  ;;  %v1593_v10 = vadd.f32 %v4263_v26, %v1592_v14  ;;  %3301 = vmatmul.msk.bf16.gmra.mxu2 %vm939_vm2, %v3430_v39  ;;  %v2022_v1 = vmax.f32 %v1446_v23, 0.0  ;;  %v1738_v39 = vadd.f32 %v4263_v26, %v4127_v53 }
 0x203   :  { %v1458_v12 = vadd.f32 %v4263_v26, %v1457_v18  ;;  %v2025_v18 = vmax.f32 %v1453_v5, 0.0 }
 0x205   :  { %v2027_v11 = vmax.f32 %v1458_v12, 0.0  ;;  %v2024_v12 = vmax.f32 %v1451_v9, 0.0  ;;  %v2023_v9 = vmax.f32 %v1448_v47, 0.0  ;;  %v2081_v47 = vmax.f32 %v1593_v10, 0.0 }
 0x207   :  { %v2267_v44 = vpack.c.bf16 %v2027_v11, %v2026_v45  ;;  %v3461_v11 = vld [vmem:[%s4988_s0 + $0x3d8] sm:$0xff]  ;;  %v2266_v45 = vpack.c.bf16 %v2025_v18, %v2024_v12  ;;  %v4311_v19 = vpop.f32.mrf.mxu2  ;;  %v2139_v12 = vmax.f32 %v1738_v39, 0.0  ;;  %v4318_v27 = vpack.c.bf16 %v2081_v47, %v2080_v38  ;;  %v3371_v39 = vld [vmem:[%s4988_s0 + $0x108] sm:$0xff]  ;;  %v3462_v38 = vld [vmem:[%s4988_s0 + $0x3e0] sm:$0xff] }
 0x208   :  { %3332 = vmatmul.msk.bf16.gmra.mxu3 %vm939_vm2, %v3461_v11  ;;  %5027 = vst [vmem:[#allocation34_spill] sm:$0xff] %v4311_v19  ;;  %v2020_v11 = vmax.f32 %v1441_v4, 0.0 }
 0x209   :  { %2454 = vmatpush.bf16.msrb.mxu3 %v2267_v44  ;;  %v4304_v44 = vpack.c.bf16 %v2137_v32, %v2136_v28  ;;  %v1595_v14 = vpop.f32.mrf.mxu1  ;;  %v4313_v18 = vpop.f32.mrf.mxu3  ;;  %v2021_v32 = vmax.f32 %v1443_v40, 0.0  ;;  %v2265_v28 = vpack.c.bf16 %v2023_v9, %v2022_v1  ;;  %v4316_v23 = vpack.c.bf16 %v2139_v12, %v2138_v16  ;;  %v3431_v16 = vld [vmem:[%s4988_s0 + $0x2e8] sm:$0xff] }
 0x20a   :  { %v1460_v5 = vpop.f32.mrf.mxu0  ;;  %5028 = vst [vmem:[#allocation35_spill] sm:$0xff] %v4313_v18  ;;  %v1578_v12 = vadd.f32 %v4263_v26, %v4165_v2 }
 0x20b   :  { %v1461_v43 = vadd.f32 %v4263_v26, %v1460_v5 }
 0x20d   :  { %3241 = vmatmul.msk.bf16.gmra.mxu0 %vm939_vm2, %v3370_v61  ;;  %2455 = vmatpush.bf16.msrb.mxu3 %v2266_v45  ;;  %v2264_v45 = vpack.c.bf16 %v2021_v32, %v2020_v11  ;;  %v2028_v10 = vmax.f32 %v1461_v43, 0.0  ;;  %v1596_v32 = vadd.f32 %v4263_v26, %v1595_v14 }
 0x20e   :  { %3269 = vmatmul.msk.bf16.gmra.mxu1 %vm939_vm2, %v3398_v7 }
 0x20f   :  { %v4324_v9 = vpop.f32.mrf.mxu2  ;;  %v2082_v14 = vmax.f32 %v1596_v32, 0.0 }
 0x210   :  { %5029 = vst [vmem:[#allocation36_spill] sm:$0xff] %v4324_v9 }
 0x211   :  { %2456 = vmatpush.bf16.msrb.mxu3 %v2265_v28  ;;  %v1597_v1 = vpop.f32.mrf.mxu1  ;;  %v4327_v5 = vpop.f32.mrf.mxu3 }
 0x212   :  { %v1462_v61 = vpop.f32.mrf.mxu0  ;;  %5030 = vst [vmem:[#allocation37_spill] sm:$0xff] %v4327_v5  ;;  %v1598_v28 = vadd.f32 %v4263_v26, %v1597_v1  ;;  %3302 = vmatmul.msk.bf16.gmra.mxu2 %vm939_vm2, %v3431_v16  ;;  %v1741_v16 = vadd.f32 %v4263_v26, %v4152_v25 }
 0x213   :  { %v1463_v53 = vadd.f32 %v4263_v26, %v1462_v61 }
 0x214   :  { %v2083_v61 = vmax.f32 %v1598_v28, 0.0 }
 0x215   :  { %v2029_v40 = vmax.f32 %v1463_v53, 0.0  ;;  %2457 = vmatpush.bf16.msrb.mxu3 %v2264_v45  ;;  %v1571_v45 = vadd.f32 %v4263_v26, %v4108_v58  ;;  %v1743_v58 = vadd.f32 %v4263_v26, %v4167_v57  ;;  %v2140_v57 = vmax.f32 %v1741_v16, 0.0 }
 0x217   :  { %v4329_v4 = vpack.c.bf16 %v2029_v40, %v2028_v10  ;;  %v4351_v43 = vpop.f32.mrf.mxu2  ;;  %v2075_v10 = vmax.f32 %v1578_v12, 0.0  ;;  %v4361_v40 = vpack.c.bf16 %v2083_v61, %v2082_v14  ;;  %v2141_v12 = vmax.f32 %v1743_v58, 0.0 }
 0x218   :  { %3333 = vmatmul.msk.bf16.gmra.mxu3 %vm939_vm2, %v3462_v38  ;;  %5031 = vst [vmem:[#allocation38_spill] sm:$0xff] %v4351_v43 }
 0x219   :  { %2458 = vmatpush.bf16.msrb.mxu3 %v4132_v42  ;;  %v1576_v42 = vadd.f32 %v4263_v26, %v4150_v51  ;;  %v1600_v11 = vpop.f32.mrf.mxu1  ;;  %v4353_v53 = vpop.f32.mrf.mxu3  ;;  %v1573_v51 = vadd.f32 %v4263_v26, %v4125_v15 }
 0x21a   :  { %v1465_v47 = vpop.f32.mrf.mxu0  ;;  %5032 = vst [vmem:[#allocation39_spill] sm:$0xff] %v4353_v53 }
 0x21b   :  { %v2074_v7 = vmax.f32 %v1576_v42, 0.0  ;;  %v1466_v2 = vadd.f32 %v4263_v26, %v1465_v47  ;;  %v2073_v38 = vmax.f32 %v1573_v51, 0.0  ;;  %v3399_v47 = vld [vmem:[%s4988_s0 + $0x1e8] sm:$0xff] }
 0x21c   :  { %v3463_v51 = vld [vmem:[%s4988_s0 + $0x3e8] sm:$0xff] }
 0x21d   :  { %3242 = vmatmul.msk.bf16.gmra.mxu0 %vm939_vm2, %v3371_v39  ;;  %2459 = vmatpush.bf16.msrb.mxu3 %v4090_v24  ;;  %v2072_v39 = vmax.f32 %v1571_v45, 0.0  ;;  %v2291_v15 = vpack.c.bf16 %v2075_v10, %v2074_v7  ;;  %v2030_v32 = vmax.f32 %v1466_v2, 0.0  ;;  %v3432_v45 = vld [vmem:[%s4988_s0 + $0x2f0] sm:$0xff]  ;;  %v1601_v10 = vadd.f32 %v4263_v26, %v1600_v11 }
 0x21e   :  { %3270 = vmatmul.msk.bf16.gmra.mxu1 %vm939_vm2, %v3399_v47 }
 0x21f   :  { %v4372_v42 = vpop.f32.mrf.mxu2  ;;  %v2290_v61 = vpack.c.bf16 %v2073_v38, %v2072_v39  ;;  %v2084_v58 = vmax.f32 %v1601_v10, 0.0 }
 0x220   :  { %5033 = vst [vmem:[#allocation40_spill] sm:$0xff] %v4372_v42 }
 0x221   :  { %2460 = vmatpush.bf16.msrb.mxu3 %v4052_v31  ;;  %v1602_v28 = vpop.f32.mrf.mxu1  ;;  %v4375_v25 = vpop.f32.mrf.mxu3 }
 0x222   :  { %v1467_v24 = vpop.f32.mrf.mxu0  ;;  %5034 = vst [vmem:[#allocation41_spill] sm:$0xff] %v4375_v25  ;;  %v1603_v2 = vadd.f32 %v4263_v26, %v1602_v28  ;;  %3303 = vmatmul.msk.bf16.gmra.mxu2 %vm939_vm2, %v3432_v45  ;;  %v1748_v28 = vadd.f32 %v4263_v26, %v4201_v35  ;;  %v3433_v35 = vld [vmem:[%s4988_s0 + $0x2f8] sm:$0xff] }
 0x223   :  { %v1468_v1 = vadd.f32 %v4263_v26, %v1467_v24  ;;  %v4392_v24 = vpack.c.bf16 %v2141_v12, %v2140_v57 }
 0x224   :  { %v2085_v39 = vmax.f32 %v1603_v2, 0.0 }
 0x225   :  { %v2031_v31 = vmax.f32 %v1468_v1, 0.0  ;;  %2461 = vmatpush.bf16.msrb.mxu3 %v4012_v46  ;;  %v3372_v46 = vld [vmem:[%s4988_s0 + $0x110] sm:$0xff]  ;;  %5035 = vst [vmem:[#allocation42_spill] sm:$0xff] %v4392_v24 }
 0x226   :  { %v4402_v47 = vpack.c.bf16 %v2085_v39, %v2084_v58 }
 0x227   :  { %v4377_v14 = vpack.c.bf16 %v2031_v31, %v2030_v32  ;;  %v4395_v16 = vpop.f32.mrf.mxu2  ;;  %v1746_v31 = vadd.f32 %v4263_v26, %v4188_v56  ;;  %v2143_v56 = vmax.f32 %v1748_v28, 0.0 }
 0x228   :  { %3334 = vmatmul.msk.bf16.gmra.mxu3 %vm939_vm2, %v3463_v51  ;;  %5036 = vst [vmem:[#allocation43_spill] sm:$0xff] %v4395_v16 }
 0x229   :  { %2493 = vmatpush.bf16.msra.mxu3 %v2291_v15  ;;  %v1605_v1 = vpop.f32.mrf.mxu1  ;;  %v4398_v38 = vpop.f32.mrf.mxu3 }
 0x22a   :  { %v1470_v7 = vpop.f32.mrf.mxu0  ;;  %5037 = vst [vmem:[#allocation44_spill] sm:$0xff] %v4398_v38  ;;  %v1606_v2 = vadd.f32 %v4263_v26, %v1605_v1 }
 0x22b   :  { %v1471_v11 = vadd.f32 %v4263_v26, %v1470_v7  ;;  %v3373_v7 = vld [vmem:[%s4988_s0 + $0x118] sm:$0xff] }
 0x22d   :  { %2494 = vmatpush.bf16.msra.mxu3 %v2290_v61  ;;  %3243 = vmatmul.msk.bf16.gmra.mxu0 %vm939_vm2, %v3372_v46  ;;  %v2032_v57 = vmax.f32 %v1471_v11, 0.0  ;;  %v2142_v46 = vmax.f32 %v1746_v31, 0.0 }
 0x22f   :  { %v4412_v45 = vpop.f32.mrf.mxu2  ;;  %v4434_v39 = vpack.c.bf16 %v2143_v56, %v2142_v46  ;;  %v3401_v46 = vld [vmem:[%s4988_s0 + $0x1f8] sm:$0xff] }
 0x230   :  { %5038 = vst [vmem:[#allocation45_spill] sm:$0xff] %v4412_v45 }
 0x231   :  { %2495 = vmatpush.bf16.msra.mxu3 %v4115_v0  ;;  %v3400_v0 = vld [vmem:[%s4988_s0 + $0x1f0] sm:$0xff]  ;;  %v1607_v61 = vpop.f32.mrf.mxu1  ;;  %5040 = vst [vmem:[#allocation47_spill] sm:$0xff] %v4434_v39 }
 0x232   :  { %v1472_v15 = vpop.f32.mrf.mxu0  ;;  %3271 = vmatmul.msk.bf16.gmra.mxu1 %vm939_vm2, %v3400_v0  ;;  %v1608_v58 = vadd.f32 %v4263_v26, %v1607_v61  ;;  %3304 = vmatmul.msk.bf16.gmra.mxu2 %vm939_vm2, %v3433_v35  ;;  %v1753_v61 = vadd.f32 %v4263_v26, %v4235_v49  ;;  %v3434_v49 = vld [vmem:[%s4988_s0 + $0x300] sm:$0xff] }
 0x233   :  { %v1473_v32 = vadd.f32 %v4263_v26, %v1472_v15 }
 0x234   :  { %v2087_v31 = vmax.f32 %v1608_v58, 0.0  ;;  %v3374_v58 = vld [vmem:[%s4988_s0 + $0x120] sm:$0xff] }
 0x235   :  { %2496 = vmatpush.bf16.msra.mxu3 %v4075_v62  ;;  %v2033_v12 = vmax.f32 %v1473_v32, 0.0  ;;  %v4416_v62 = vpop.f32.mrf.mxu3  ;;  %v2086_v32 = vmax.f32 %v1606_v2, 0.0 }
 0x236   :  { %5039 = vst [vmem:[#allocation46_spill] sm:$0xff] %v4416_v62 }
 0x237   :  { %v4418_v51 = vpack.c.bf16 %v2033_v12, %v2032_v57  ;;  %v4439_v15 = vpop.f32.mrf.mxu2  ;;  %v4445_v0 = vpack.c.bf16 %v2087_v31, %v2086_v32  ;;  %v1751_v12 = vadd.f32 %v4263_v26, %v4222_v17  ;;  %v3465_v32 = vld [vmem:[%s4988_s0 + $0x3f8] sm:$0xff] }
 0x238   :  { %5041 = vst [vmem:[#allocation48_spill] sm:$0xff] %v4439_v15 }
 0x239   :  { %2497 = vmatpush.bf16.msra.mxu3 %v4036_v22  ;;  %v3464_v22 = vld [vmem:[%s4988_s0 + $0x3f0] sm:$0xff]  ;;  %v4437_v11 = vpop.f32.mrf.mxu1 }
 0x23a   :  { %v1475_v10 = vpop.f32.mrf.mxu0  ;;  %3335 = vmatmul.msk.bf16.gmra.mxu3 %vm939_vm2, %v3464_v22  ;;  %v2144_v22 = vmax.f32 %v1751_v12, 0.0 }
 0x23d   :  { %2498 = vmatpush.bf16.msra.mxu3 %v4001_v29  ;;  %3244 = vmatmul.msk.bf16.gmra.mxu0 %vm939_vm2, %v3373_v7  ;;  %v4442_v1 = vpop.f32.mrf.mxu3  ;;  %v1476_v29 = vadd.f32 %v4263_v26, %v1475_v10  ;;  %v2145_v10 = vmax.f32 %v1753_v61, 0.0 }
 0x23e   :  { %5042 = vst [vmem:[#allocation49_spill] sm:$0xff] %v4442_v1 }
 0x23f   :  { %v4455_v35 = vpop.f32.mrf.mxu2 }
 0x240   :  { %5043 = vst [vmem:[#allocation50_spill] sm:$0xff] %v4455_v35 }
 0x241   :  { %2499 = vmatpush.bf16.msra.mxu3 %v3950_v48  ;;  %v2034_v48 = vmax.f32 %v1476_v29, 0.0  ;;  %v4460_v2 = vpop.f32.mrf.mxu1  ;;  %v4477_v29 = vpack.c.bf16 %v2145_v10, %v2144_v22  ;;  %v3375_v10 = vld [vmem:[%s4988_s0 + $0x128] sm:$0xff] }
 0x242   :  { %v1477_v28 = vpop.f32.mrf.mxu0  ;;  %3272 = vmatmul.msk.bf16.gmra.mxu1 %vm939_vm2, %v3401_v46  ;;  %3305 = vmatmul.msk.bf16.gmra.mxu2 %vm939_vm2, %v3434_v49  ;;  %v3402_v46 = vld [vmem:[%s4988_s0 + $0x200] sm:$0xff] }
 0x243   :  { %v1478_v57 = vadd.f32 %v4263_v26, %v1477_v28  ;;  %5045 = vst [vmem:[#allocation52_spill] sm:$0xff] %v4477_v29 }
 0x245   :  { %v2035_v56 = vmax.f32 %v1478_v57, 0.0  ;;  %v4458_v7 = vpop.f32.mrf.mxu3 }
 0x246   :  { %5044 = vst [vmem:[#allocation51_spill] sm:$0xff] %v4458_v7 }
 0x247   :  { %v4462_v17 = vpack.c.bf16 %v2035_v56, %v2034_v48  ;;  %v4480_v28 = vpop.f32.mrf.mxu2 }
 0x248   :  { %5046 = vst [vmem:[#allocation53_spill] sm:$0xff] %v4480_v28  ;;  %v3404_v28 = vld [vmem:[%s4988_s0 + $0x210] sm:$0xff] }
 0x249   :  { %v4484_v12 = vpop.f32.mrf.mxu1 }
 0x24a   :  { %v4473_v31 = vpop.f32.mrf.mxu0  ;;  %3336 = vmatmul.msk.bf16.gmra.mxu3 %vm939_vm2, %v3465_v32 }
 0x24d   :  { %3245 = vmatmul.msk.bf16.gmra.mxu0 %vm939_vm2, %v3374_v58  ;;  %v4482_v57 = vpop.f32.mrf.mxu3 }
 0x24e   :  { %5047 = vst [vmem:[#allocation54_spill] sm:$0xff] %v4482_v57 }
 0x24f   :  { %v4491_v48 = vpop.f32.mrf.mxu2 }
 0x250   :  { %5048 = vst [vmem:[#allocation55_spill] sm:$0xff] %v4491_v48 }
 0x251   :  { %v4496_v22 = vpop.f32.mrf.mxu1 }
 0x252   :  { %v4486_v61 = vpop.f32.mrf.mxu0  ;;  %3273 = vmatmul.msk.bf16.gmra.mxu1 %vm939_vm2, %v3402_v46  ;;  %v3403_v46 = vld [vmem:[%s4988_s0 + $0x208] sm:$0xff] }
 0x255   :  { %v4494_v56 = vpop.f32.mrf.mxu3 }
 0x256   :  { %5049 = vst [vmem:[#allocation56_spill] sm:$0xff] %v4494_v56 }
 0x257   :  { %v4502_v58 = vpop.f32.mrf.mxu2 }
 0x258   :  { %5050 = vst [vmem:[#allocation57_spill] sm:$0xff] %v4502_v58 }
 0x259   :  { %v1620_v24 = vpop.f32.mrf.mxu1 }
 0x25a   :  { %v1485_v49 = vpop.f32.mrf.mxu0  ;;  %v1621_v53 = vadd.f32 %v4263_v26, %v1620_v24 }
 0x25b   :  { %v1486_v15 = vadd.f32 %v4263_v26, %v1485_v49 }
 0x25c   :  { %v2092_v7 = vmax.f32 %v1621_v53, 0.0  ;;  %v3377_v53 = vld [vmem:[%s4988_s0 + $0x138] sm:$0xff] }
 0x25d   :  { %3246 = vmatmul.msk.bf16.gmra.mxu0 %vm939_vm2, %v3375_v10  ;;  %v4504_v32 = vpop.f32.mrf.mxu3  ;;  %v3376_v10 = vld [vmem:[%s4988_s0 + $0x130] sm:$0xff] }
 0x25f   :  { %v4509_v5 = vpop.f32.mrf.mxu2 }
 0x260   :  { %5051 = vst [vmem:[#allocation58_spill] sm:$0xff] %v4509_v5 }
 0x261   :  { %v1622_v29 = vpop.f32.mrf.mxu1 }
 0x262   :  { %v1487_v39 = vpop.f32.mrf.mxu0  ;;  %3274 = vmatmul.msk.bf16.gmra.mxu1 %vm939_vm2, %v3403_v46  ;;  %v1623_v62 = vadd.f32 %v4263_v26, %v1622_v29 }
 0x264   :  { %v2093_v1 = vmax.f32 %v1623_v62, 0.0 }
 0x265   :  { %v4512_v18 = vpop.f32.mrf.mxu3 }
 0x266   :  { %v4526_v48 = vpack.c.bf16 %v2093_v1, %v2092_v7 }
 0x267   :  { %v4520_v38 = vpop.f32.mrf.mxu2 }
 0x268   :  { %5052 = vst [vmem:[#allocation59_spill] sm:$0xff] %v4520_v38 }
 0x269   :  { %v4524_v46 = vpop.f32.mrf.mxu1  ;;  %5054 = vst [vmem:[#allocation61_spill] sm:$0xff] %v4526_v48 }
 0x26a   :  { %v1490_v25 = vpop.f32.mrf.mxu0  ;;  %5053 = vst [vmem:[#allocation60_spill] sm:$0xff] %v4524_v46 }
 0x26b   :  { %v1491_v38 = vadd.f32 %v4263_v26, %v1490_v25 }
 0x26d   :  { %3247 = vmatmul.msk.bf16.gmra.mxu0 %vm939_vm2, %v3376_v10  ;;  %v4522_v56 = vpop.f32.mrf.mxu3 }
 0x26f   :  { %v4531_v24 = vpop.f32.mrf.mxu2 }
 0x270   :  { %5055 = vst [vmem:[#allocation62_spill] sm:$0xff] %v4531_v24 }
 0x271   :  { %v4536_v10 = vpop.f32.mrf.mxu1 }
 0x272   :  { %v1492_v57 = vpop.f32.mrf.mxu0  ;;  %3275 = vmatmul.msk.bf16.gmra.mxu1 %vm939_vm2, %v3404_v28  ;;  %5056 = vst [vmem:[#allocation63_spill] sm:$0xff] %v4536_v10  ;;  %v4552_v28 = vld [vmem:[%s4989_s3] sm:$0xff]  ;;  %v2040_v10 = vmax.f32 %v1491_v38, 0.0 }
 0x273   :  { %v2380_v19 = vunpack.c.l.b16 %v4552_v28  ;;  %v1493_v48 = vadd.f32 %v4263_v26, %v1492_v57 }
 0x275   :  { %v4534_v29 = vpop.f32.mrf.mxu3  ;;  %v2396_v24 = vpack.c.b16 %v2380_v19, %v2380_v19  ;;  %v3378_v19 = vld [vmem:[%s4988_s0 + $0x140] sm:$0xff] }
 0x277   :  { %v4542_v1 = vpop.f32.mrf.mxu2 }
 0x278   :  { %5057 = vst [vmem:[#allocation64_spill] sm:$0xff] %v4542_v1  ;;  %v2041_v1 = vmax.f32 %v1493_v48, 0.0  ;;  %v2038_v48 = vmax.f32 %v1486_v15, 0.0 }
 0x279   :  { %v4544_v7 = vpop.f32.mrf.mxu1 }
 0x27a   :  { %v1495_v62 = vpop.f32.mrf.mxu0 }
 0x27b   :  { %v1496_v58 = vadd.f32 %v4263_v26, %v1495_v62  ;;  %v1488_v62 = vadd.f32 %v4263_v26, %v1487_v39  ;;  %v1483_v39 = vadd.f32 %v4263_v26, %v4486_v61 }
 0x27d   :  { %3248 = vmatmul.msk.bf16.gmra.mxu0 %vm939_vm2, %v3377_v53  ;;  %v4546_v5 = vpop.f32.mrf.mxu3  ;;  %v2042_v42 = vmax.f32 %v1496_v58, 0.0  ;;  %v2039_v57 = vmax.f32 %v1488_v62, 0.0  ;;  %v2037_v38 = vmax.f32 %v1483_v39, 0.0 }
 0x27f   :  { %v4561_v35 = vpop.f32.mrf.mxu2 }
 0x280   :  { %5058 = vst [vmem:[#allocation65_spill] sm:$0xff] %v4561_v35 }
 0x281   :  { %v4559_v16 = vpop.f32.mrf.mxu1 }
 0x282   :  { %v1497_v9 = vpop.f32.mrf.mxu0  ;;  %2436 = vmatmul.bf16.vlgmr.msrb.gmra.mxu1 %v2396_v24 }
 0x283   :  { %v1498_v53 = vadd.f32 %v4263_v26, %v1497_v9 }
 0x285   :  { %v2043_v43 = vmax.f32 %v1498_v53, 0.0  ;;  %v4567_v9 = vpop.f32.mrf.mxu3 }
 0x287   :  { %v2275_v45 = vpack.c.bf16 %v2043_v43, %v2042_v42  ;;  %v2274_v43 = vpack.c.bf16 %v2041_v1, %v2040_v10  ;;  %v1481_v42 = vadd.f32 %v4263_v26, %v4473_v31  ;;  %v4577_v35 = vpop.f32.mrf.mxu2 }
 0x288   :  { %5059 = vst [vmem:[#allocation66_spill] sm:$0xff] %v4577_v35 }
 0x289   :  { %2467 = vmatpush.bf16.msra.mxu1 %v2275_v45  ;;  %v2273_v45 = vpack.c.bf16 %v2039_v57, %v2038_v48  ;;  %v4574_v49 = vpop.f32.mrf.mxu1  ;;  %v2036_v58 = vmax.f32 %v1481_v42, 0.0  ;;  %v1618_v57 = vadd.f32 %v4263_v26, %v4496_v22  ;;  %v4599_v48 = vld [vmem:[%s4989_s3 + $0x8] sm:$0xff] }
 0x28a   :  { %v1500_v25 = vpop.f32.mrf.mxu0 }
 0x28b   :  { %v1501_v24 = vadd.f32 %v4263_v26, %v1500_v25  ;;  %v2272_v10 = vpack.c.bf16 %v2037_v38, %v2036_v58  ;;  %v1616_v25 = vadd.f32 %v4263_v26, %v4484_v12  ;;  %v1613_v12 = vadd.f32 %v4263_v26, %v4460_v2 }
 0x28c   :  { %v2383_v58 = vunpack.c.h.b16 %v4599_v48 }
 0x28d   :  { %3249 = vmatmul.msk.bf16.gmra.mxu0 %vm939_vm2, %v3378_v19  ;;  %2468 = vmatpush.bf16.msra.mxu1 %v2274_v43  ;;  %v4580_v1 = vpop.f32.mrf.mxu3  ;;  %v2044_v15 = vmax.f32 %v1501_v24, 0.0  ;;  %v2090_v22 = vmax.f32 %v1616_v25, 0.0 }
 0x28f   :  { %v4591_v43 = vpop.f32.mrf.mxu2 }
 0x290   :  { %5060 = vst [vmem:[#allocation67_spill] sm:$0xff] %v4591_v43 }
 0x291   :  { %2469 = vmatpush.bf16.msra.mxu1 %v2273_v45  ;;  %v4584_v19 = vpop.f32.mrf.mxu1  ;;  %v2091_v45 = vmax.f32 %v1618_v57, 0.0 }
 0x292   :  { %v1502_v53 = vpop.f32.mrf.mxu0 }
 0x293   :  { %v1503_v61 = vadd.f32 %v4263_v26, %v1502_v53 }
 0x295   :  { %v2045_v31 = vmax.f32 %v1503_v61, 0.0  ;;  %2470 = vmatpush.bf16.msra.mxu1 %v2272_v10  ;;  %v4594_v42 = vpop.f32.mrf.mxu3  ;;  %v2089_v10 = vmax.f32 %v1613_v12, 0.0 }
 0x297   :  { %v4582_v62 = vpack.c.bf16 %v2045_v31, %v2044_v15  ;;  %v2299_v15 = vpack.c.bf16 %v2091_v45, %v2090_v22  ;;  %v4612_v2 = vpop.f32.mrf.mxu2 }
 0x298   :  { %5061 = vst [vmem:[#allocation68_spill] sm:$0xff] %v4612_v2 }
 0x299   :  { %2471 = vmatpush.bf16.msra.mxu1 %v4462_v17  ;;  %v1611_v17 = vadd.f32 %v4263_v26, %v4437_v11  ;;  %v4603_v38 = vpop.f32.mrf.mxu1  ;;  %v2399_v11 = vpack.c.b16 %v2383_v58, %v2383_v58 }
 0x29a   :  { %v1505_v39 = vpop.f32.mrf.mxu0 }
 0x29b   :  { %v2088_v61 = vmax.f32 %v1611_v17, 0.0 }
 0x29d   :  { %2472 = vmatpush.bf16.msra.mxu1 %v4418_v51  ;;  %v1506_v51 = vadd.f32 %v4263_v26, %v1505_v39  ;;  %v4618_v39 = vpop.f32.mrf.mxu3 }
 0x29f   :  { %v2046_v31 = vmax.f32 %v1506_v51, 0.0  ;;  %v4621_v12 = vpop.f32.mrf.mxu2 }
 0x2a0   :  { %5062 = vst [vmem:[#allocation69_spill] sm:$0xff] %v4621_v12 }
 0x2a1   :  { %2473 = vmatpush.bf16.msra.mxu1 %v4377_v14  ;;  %v4616_v57 = vpop.f32.mrf.mxu1  ;;  %v2298_v14 = vpack.c.bf16 %v2089_v10, %v2088_v61 }
 0x2a2   :  { %v1507_v24 = vpop.f32.mrf.mxu0 }
 0x2a3   :  { %v1508_v53 = vadd.f32 %v4263_v26, %v1507_v24 }
 0x2a5   :  { %v2047_v43 = vmax.f32 %v1508_v53, 0.0  ;;  %2474 = vmatpush.bf16.msra.mxu1 %v4329_v4  ;;  %v4624_v22 = vpop.f32.mrf.mxu3 }
 0x2a7   :  { %v4614_v25 = vpack.c.bf16 %v2047_v43, %v2046_v31 }
 0x2a8   :  { %2475 = vmatmul.bf16.vlgmr.msra.gmra.mxu1 %v2399_v11 }
 0x2a9   :  { %2506 = vmatpush.bf16.msrb.mxu1 %v2299_v15  ;;  %v1645_v17 = vpop.f32.mrf.mxu1 }
 0x2aa   :  { %v1510_v24 = vpop.f32.mrf.mxu0  ;;  %v1646_v58 = vadd.f32 %v4263_v26, %v1645_v17 }
 0x2ab   :  { %v1511_v4 = vadd.f32 %v4263_v26, %v1510_v24 }
 0x2ac   :  { %v2102_v10 = vmax.f32 %v1646_v58, 0.0 }
 0x2ad   :  { %2507 = vmatpush.bf16.msrb.mxu1 %v2298_v14  ;;  %v2048_v51 = vmax.f32 %v1511_v4, 0.0  ;;  %v4634_v14 = vpop.f32.mrf.mxu2  ;;  %v4641_v24 = vpop.f32.mrf.mxu3 }
 0x2b1   :  { %2508 = vmatpush.bf16.msrb.mxu1 %v4445_v0  ;;  %v1647_v0 = vpop.f32.mrf.mxu1 }
 0x2b2   :  { %v1512_v45 = vpop.f32.mrf.mxu0  ;;  %v1648_v15 = vadd.f32 %v4263_v26, %v1647_v0 }
 0x2b3   :  { %v1513_v43 = vadd.f32 %v4263_v26, %v1512_v45 }
 0x2b4   :  { %v2103_v31 = vmax.f32 %v1648_v15, 0.0 }
 0x2b5   :  { %2509 = vmatpush.bf16.msrb.mxu1 %v4402_v47  ;;  %v2049_v53 = vmax.f32 %v1513_v43, 0.0  ;;  %v4639_v47 = vld [vmem:[%s4989_s3 + $0x18] sm:$0xff]  ;;  %v4651_v58 = vpop.f32.mrf.mxu2 }
 0x2b6   :  { %5063 = vst [vmem:[#allocation70_spill] sm:$0xff] %v4639_v47  ;;  %v2386_v17 = vunpack.c.l.b16 %v4639_v47 }
 0x2b7   :  { %v4630_v61 = vpack.c.bf16 %v2049_v53, %v2048_v51 }
 0x2b8   :  { %v2402_v45 = vpack.c.b16 %v2386_v17, %v2386_v17  ;;  %v1856_v17 = vadd.f32 %v4263_v26, %v3851_v60  ;;  %v1853_v60 = vadd.f32 %v4263_v26, %v3831_v52  ;;  %v1841_v52 = vadd.f32 %v4263_v26, %v3763_v59 }
 0x2b9   :  { %2510 = vmatpush.bf16.msrb.mxu1 %v4361_v40  ;;  %v4643_v40 = vpack.c.bf16 %v2103_v31, %v2102_v10  ;;  %v4653_v0 = vpop.f32.mrf.mxu1  ;;  %v4655_v10 = vpop.f32.mrf.mxu3  ;;  %v1838_v59 = vadd.f32 %v4263_v26, %v3743_v63 }
 0x2ba   :  { %v1515_v11 = vpop.f32.mrf.mxu0  ;;  %v2185_v47 = vmax.f32 %v1853_v60, 0.0 }
 0x2bb   :  { %v1516_v4 = vadd.f32 %v4263_v26, %v1515_v11 }
 0x2bd   :  { %2511 = vmatpush.bf16.msrb.mxu1 %v4318_v27  ;;  %v2050_v51 = vmax.f32 %v1516_v4, 0.0  ;;  %v1851_v4 = vadd.f32 %v4263_v26, %v3821_v41  ;;  %v1848_v41 = vadd.f32 %v4263_v26, %v3803_v33 }
 0x2c1   :  { %2512 = vmatpush.bf16.msrb.mxu1 %v4266_v37  ;;  %v4668_v11 = vpop.f32.mrf.mxu3 }
 0x2c2   :  { %v1517_v27 = vpop.f32.mrf.mxu0 }
 0x2c3   :  { %v1518_v43 = vadd.f32 %v4263_v26, %v1517_v27 }
 0x2c5   :  { %2513 = vmatpush.bf16.msrb.mxu1 %v4226_v36  ;;  %v2051_v53 = vmax.f32 %v1518_v43, 0.0  ;;  %v4663_v36 = vpop.f32.mrf.mxu2 }
 0x2c7   :  { %v4657_v37 = vpack.c.bf16 %v2051_v53, %v2050_v51  ;;  %v1846_v51 = vadd.f32 %v4263_v26, %v3793_v21  ;;  %v2184_v53 = vmax.f32 %v1851_v4, 0.0 }
 0x2c8   :  { %2514 = vmatmul.bf16.vlgmr.msrb.gmra.mxu1 %v2402_v45 }
 0x2c9   :  { %2545 = vmatpush.bf16.msra.mxu1 %v4316_v23  ;;  %v4666_v23 = vpop.f32.mrf.mxu1  ;;  %v2346_v21 = vpack.c.bf16 %v2185_v47, %v2184_v53  ;;  %v2381_v47 = vunpack.c.h.b16 %v4552_v28 }
 0x2ca   :  { %v4660_v15 = vpop.f32.mrf.mxu0 }
 0x2cb   :  { %v2397_v63 = vpack.c.b16 %v2381_v47, %v2381_v47 }
 0x2cd   :  { %2546 = vmatpush.bf16.msra.mxu1 %v4304_v44  ;;  %v1858_v44 = vadd.f32 %v4263_v26, %v3865_v6  ;;  %v2186_v6 = vmax.f32 %v1856_v17, 0.0  ;;  %v1843_v17 = vadd.f32 %v4263_v26, %v3775_v13  ;;  %2449 = vmatmul.bf16.vlgmr.msrb.gmra.mxu2 %v2397_v63 }
 0x2cf   :  { %v2187_v27 = vmax.f32 %v1858_v44, 0.0  ;;  %v2183_v44 = vmax.f32 %v1848_v41, 0.0  ;;  %v2181_v60 = vmax.f32 %v1843_v17, 0.0  ;;  %v5066_v17 = vld [vmem:[#allocation2_spill] sm:$0xff] }
 0x2d1   :  { %2547 = vmatpush.bf16.msra.mxu1 %v4253_v55  ;;  %v4678_v55 = vpop.f32.mrf.mxu2  ;;  %v4687_v45 = vpop.f32.mrf.mxu1  ;;  %v2347_v35 = vpack.c.bf16 %v2187_v27, %v2186_v6  ;;  %v1831_v6 = vadd.f32 %v4263_v26, %v3701_v20 }
 0x2d2   :  { %v4670_v31 = vpop.f32.mrf.mxu0 }
 0x2d5   :  { %2548 = vmatpush.bf16.msra.mxu1 %v4219_v34  ;;  %v4683_v34 = vld [vmem:[%s4989_s3 + $0x20] sm:$0xff] }
 0x2d6   :  { %5064 = vst [vmem:[#allocation71_spill] sm:$0xff] %v4683_v34  ;;  %v2389_v43 = vunpack.c.h.b16 %v4683_v34 }
 0x2d8   :  { %v2405_v12 = vpack.c.b16 %v2389_v43, %v2389_v43 }
 0x2d9   :  { %2549 = vmatpush.bf16.msra.mxu1 %v4185_v3  ;;  %v4689_v3 = vpop.f32.mrf.mxu3  ;;  %v1820_v46 = vpop.f32.mrf.mxu2 }
 0x2da   :  { %v4708_v33 = vpop.f32.mrf.mxu1 }
 0x2dd   :  { %2550 = vmatpush.bf16.msra.mxu1 %v4147_v30  ;;  %v4693_v30 = vpop.f32.mrf.mxu0 }
 0x2e1   :  { %2551 = vmatpush.bf16.msra.mxu1 %v4105_v54  ;;  %v2182_v54 = vmax.f32 %v1846_v51, 0.0  ;;  %v1975_v4 = vpop.f32.mrf.mxu3  ;;  %v2179_v51 = vmax.f32 %v1838_v59, 0.0 }
 0x2e3   :  { %v2345_v13 = vpack.c.bf16 %v2183_v44, %v2182_v54  ;;  %v1826_v54 = vadd.f32 %v4263_v26, %v5066_v17  ;;  %v5067_v44 = vld [vmem:[#allocation3_spill] sm:$0xff] }
 0x2e4   :  { %v1828_v20 = vadd.f32 %v4263_v26, %v5067_v44 }
 0x2e5   :  { %2552 = vmatpush.bf16.msra.mxu1 %v4067_v8  ;;  %v4706_v2 = vpop.f32.mrf.mxu0  ;;  %v1836_v8 = vadd.f32 %v4263_v26, %v3733_v50  ;;  %v2382_v50 = vunpack.c.l.b16 %v4599_v48  ;;  %v1976_v48 = vadd.f32 %v4263_v26, %v1975_v4 }
 0x2e6   :  { %v2175_v17 = vmax.f32 %v1828_v20, 0.0  ;;  %v1966_v20 = vadd.f32 %v4263_v26, %v4641_v24  ;;  %v1956_v24 = vadd.f32 %v4263_v26, %v4580_v1 }
 0x2e7   :  { %v2178_v43 = vmax.f32 %v1836_v8, 0.0  ;;  %v2398_v59 = vpack.c.b16 %v2382_v50, %v2382_v50  ;;  %v1973_v50 = vadd.f32 %v4263_v26, %v4689_v3  ;;  %v1963_v3 = vadd.f32 %v4263_v26, %v4624_v22 }
 0x2e8   :  { %2553 = vmatmul.bf16.vlgmr.msra.gmra.mxu1 %v2405_v12  ;;  %v5065_v12 = vld [vmem:[#allocation4_spill] sm:$0xff] }
 0x2e9   :  { %2584 = vmatpush.bf16.msrb.mxu1 %v2347_v35  ;;  %v2180_v35 = vmax.f32 %v1841_v52, 0.0  ;;  %v1833_v27 = vadd.f32 %v4263_v26, %v5065_v12  ;;  %v1822_v52 = vpop.f32.mrf.mxu2  ;;  %v1977_v28 = vpop.f32.mrf.mxu3  ;;  %v2343_v8 = vpack.c.bf16 %v2179_v51, %v2178_v43  ;;  %2462 = vmatmul.bf16.vlgmr.msrb.gmra.mxu3 %v2398_v59 }
 0x2ea   :  { %v1978_v47 = vadd.f32 %v4263_v26, %v1977_v28 }
 0x2eb   :  { %v2344_v53 = vpack.c.bf16 %v2181_v60, %v2180_v35  ;;  %v2177_v12 = vmax.f32 %v1833_v27, 0.0  ;;  %v1821_v35 = vadd.f32 %v4263_v26, %v1820_v46  ;;  %v1823_v60 = vadd.f32 %v4263_v26, %v1822_v52 }
 0x2ec   :  { %v2234_v27 = vmax.f32 %v1976_v48, 0.0  ;;  %v2235_v51 = vmax.f32 %v1978_v47, 0.0  ;;  %v1971_v46 = vadd.f32 %v4263_v26, %v4668_v11  ;;  %v1961_v11 = vadd.f32 %v4263_v26, %v4618_v39 }
 0x2ed   :  { %2585 = vmatpush.bf16.msrb.mxu1 %v2346_v21  ;;  %v1530_v41 = vpop.f32.mrf.mxu0  ;;  %v4724_v21 = vpop.f32.mrf.mxu1  ;;  %v2173_v43 = vmax.f32 %v1823_v60, 0.0  ;;  %v2229_v60 = vmax.f32 %v1963_v3, 0.0  ;;  %v1948_v3 = vadd.f32 %v4263_v26, %v4534_v29  ;;  %v1943_v29 = vadd.f32 %v4263_v26, %v4512_v18 }
 0x2ee   :  { %v2232_v28 = vmax.f32 %v1971_v46, 0.0  ;;  %v2228_v48 = vmax.f32 %v1961_v11, 0.0 }
 0x2f1   :  { %2586 = vmatpush.bf16.msrb.mxu1 %v2345_v13  ;;  %v2176_v13 = vmax.f32 %v1831_v6, 0.0  ;;  %v2172_v6 = vmax.f32 %v1821_v35, 0.0 }
 0x2f3   :  { %v2342_v34 = vpack.c.bf16 %v2177_v12, %v2176_v13  ;;  %v2340_v52 = vpack.c.bf16 %v2173_v43, %v2172_v6  ;;  %v2233_v13 = vmax.f32 %v1973_v50, 0.0  ;;  %v2226_v43 = vmax.f32 %v1956_v24, 0.0 }
 0x2f4   :  { %v1951_v50 = vadd.f32 %v4263_v26, %v4546_v5  ;;  %v1523_v5 = vadd.f32 %v4263_v26, %v4670_v31 }
 0x2f5   :  { %2587 = vmatpush.bf16.msrb.mxu1 %v2344_v53  ;;  %v2174_v53 = vmax.f32 %v1826_v54, 0.0  ;;  %v1532_v44 = vpop.f32.mrf.mxu0  ;;  %v4734_v63 = vpop.f32.mrf.mxu1  ;;  %v2371_v54 = vpack.c.bf16 %v2235_v51, %v2234_v27  ;;  %v2370_v35 = vpack.c.bf16 %v2233_v13, %v2232_v28  ;;  %v1531_v27 = vadd.f32 %v4263_v26, %v1530_v41 }
 0x2f6   :  { %v2368_v51 = vpack.c.bf16 %v2229_v60, %v2228_v48  ;;  %v1526_v41 = vadd.f32 %v4263_v26, %v4693_v30  ;;  %v1521_v30 = vadd.f32 %v4263_v26, %v4660_v15  ;;  %v2053_v24 = vmax.f32 %v1523_v5, 0.0 }
 0x2f7   :  { %v2341_v4 = vpack.c.bf16 %v2175_v17, %v2174_v53  ;;  %v1533_v17 = vadd.f32 %v4263_v26, %v1532_v44  ;;  %v2223_v48 = vmax.f32 %v1948_v3, 0.0 }
 0x2f9   :  { %2588 = vmatpush.bf16.msrb.mxu1 %v2343_v8  ;;  %v2230_v8 = vmax.f32 %v1966_v20, 0.0  ;;  %v2057_v44 = vmax.f32 %v1533_v17, 0.0  ;;  %v2056_v20 = vmax.f32 %v1531_v27, 0.0  ;;  %v2238_v27 = vld [vmem:[%s4989_s3 + $0x10] sm:$0xff] }
 0x2fb   :  { %v2282_v11 = vpack.c.bf16 %v2057_v44, %v2056_v20 }
 0x2fd   :  { %2589 = vmatpush.bf16.msrb.mxu1 %v2342_v34  ;;  %v1968_v34 = vadd.f32 %v4263_v26, %v4655_v10  ;;  %v1535_v12 = vpop.f32.mrf.mxu0  ;;  %v1958_v10 = vadd.f32 %v4263_v26, %v4594_v42  ;;  %v4749_v53 = vpop.f32.mrf.mxu1 }
 0x2fe   :  { %v1536_v47 = vadd.f32 %v4263_v26, %v1535_v12 }
 0x2ff   :  { %v2231_v59 = vmax.f32 %v1968_v34, 0.0  ;;  %v2227_v1 = vmax.f32 %v1958_v10, 0.0  ;;  %v2224_v34 = vmax.f32 %v1951_v50, 0.0 }
 0x300   :  { %v2058_v46 = vmax.f32 %v1536_v47, 0.0  ;;  %v2052_v47 = vmax.f32 %v1521_v30, 0.0 }
 0x301   :  { %2590 = vmatpush.bf16.msrb.mxu1 %v2341_v4  ;;  %v2369_v39 = vpack.c.bf16 %v2231_v59, %v2230_v8  ;;  %v1953_v4 = vadd.f32 %v4263_v26, %v4567_v9  ;;  %v2367_v13 = vpack.c.bf16 %v2227_v1, %v2226_v43  ;;  %v2054_v59 = vmax.f32 %v1526_v41, 0.0 }
 0x302   :  { %v2221_v1 = vmax.f32 %v1943_v29, 0.0 }
 0x303   :  { %v2225_v28 = vmax.f32 %v1953_v4, 0.0  ;;  %v5068_v4 = vld [vmem:[#allocation16_spill] sm:$0xff] }
 0x305   :  { %2591 = vmatpush.bf16.msrb.mxu1 %v2340_v52  ;;  %v1537_v22 = vpop.f32.mrf.mxu0  ;;  %v1528_v52 = vadd.f32 %v4263_v26, %v4706_v2  ;;  %v1946_v2 = vadd.f32 %v4263_v26, %v4522_v56  ;;  %v4768_v8 = vpop.f32.mrf.mxu1  ;;  %v1941_v56 = vadd.f32 %v4263_v26, %v4504_v32 }
 0x306   :  { %v1538_v6 = vadd.f32 %v4263_v26, %v1537_v22 }
 0x307   :  { %v2055_v9 = vmax.f32 %v1528_v52, 0.0  ;;  %v2222_v10 = vmax.f32 %v1946_v2, 0.0  ;;  %v2220_v43 = vmax.f32 %v1941_v56, 0.0 }
 0x308   :  { %v2059_v42 = vmax.f32 %v1538_v6, 0.0 }
 0x309   :  { %2623 = vmatpush.bf16.msra.mxu1 %v2371_v54  ;;  %v2281_v31 = vpack.c.bf16 %v2055_v9, %v2054_v59  ;;  %v2365_v22 = vpack.c.bf16 %v2223_v48, %v2222_v10  ;;  %v2364_v50 = vpack.c.bf16 %v2221_v1, %v2220_v43  ;;  %v5075_v43 = vld [vmem:[#allocation63_spill] sm:$0xff] }
 0x30a   :  { %v2283_v54 = vpack.c.bf16 %v2059_v42, %v2058_v46 }
 0x30c   :  { %2480 = vmatpush.bf16.msra.mxu2 %v2283_v54  ;;  %v5069_v54 = vld [vmem:[#allocation14_spill] sm:$0xff] }
 0x30d   :  { %2624 = vmatpush.bf16.msra.mxu1 %v2370_v35  ;;  %v1540_v12 = vpop.f32.mrf.mxu0  ;;  %v2366_v35 = vpack.c.bf16 %v2225_v28, %v2224_v34  ;;  %v1670_v46 = vpop.f32.mrf.mxu1 }
 0x30e   :  { %v1541_v60 = vadd.f32 %v4263_v26, %v1540_v12 }
 0x310   :  { %2481 = vmatpush.bf16.msra.mxu2 %v2282_v11  ;;  %v2060_v17 = vmax.f32 %v1541_v60, 0.0 }
 0x311   :  { %2625 = vmatpush.bf16.msra.mxu1 %v2369_v39  ;;  %v2280_v39 = vpack.c.bf16 %v2053_v24, %v2052_v47 }
 0x314   :  { %2482 = vmatpush.bf16.msra.mxu2 %v2281_v31 }
 0x315   :  { %2626 = vmatpush.bf16.msra.mxu1 %v2368_v51  ;;  %v1542_v15 = vpop.f32.mrf.mxu0  ;;  %v2385_v51 = vunpack.c.h.b16 %v2238_v27  ;;  %v1672_v41 = vpop.f32.mrf.mxu1 }
 0x316   :  { %v1543_v6 = vadd.f32 %v4263_v26, %v1542_v15  ;;  %v4786_v26 = vld [vmem:[%s4987_s2] ss:$0 sm:$0xff] }
 0x317   :  { %v2401_v42 = vpack.c.b16 %v2385_v51, %v2385_v51  ;;  %v1656_v52 = vadd.f32 %v4786_v26, %v4687_v45  ;;  %v1658_v44 = vadd.f32 %v4786_v26, %v4708_v33  ;;  %v1653_v20 = vadd.f32 %v4786_v26, %v4666_v23  ;;  %v5070_v33 = vld [vmem:[#allocation11_spill] sm:$0xff]  ;;  %v5071_v23 = vld [vmem:[#allocation8_spill] sm:$0xff] }
 0x318   :  { %v2061_v32 = vmax.f32 %v1543_v6, 0.0  ;;  %2483 = vmatpush.bf16.msra.mxu2 %v2280_v39  ;;  %v1671_v45 = vadd.f32 %v4786_v26, %v1670_v46  ;;  %v1643_v3 = vadd.f32 %v4786_v26, %v4616_v57  ;;  %v1666_v59 = vadd.f32 %v4786_v26, %v4749_v53  ;;  %v5073_v6 = vld [vmem:[#allocation71_spill] sm:$0xff] }
 0x319   :  { %2627 = vmatpush.bf16.msra.mxu1 %v2367_v13  ;;  %v2106_v34 = vmax.f32 %v1656_v52, 0.0  ;;  %v2107_v28 = vmax.f32 %v1658_v44, 0.0  ;;  %v2384_v13 = vunpack.c.l.b16 %v2238_v27  ;;  %v2105_v12 = vmax.f32 %v1653_v20, 0.0  ;;  %v5078_v20 = vld [vmem:[#allocation48_spill] sm:$0xff] }
 0x31a   :  { %v2284_v18 = vpack.c.bf16 %v2061_v32, %v2060_v17  ;;  %v1638_v24 = vadd.f32 %v4786_v26, %v4584_v19  ;;  %v2101_v57 = vmax.f32 %v1643_v3, 0.0  ;;  %v1816_v48 = vadd.f32 %v4786_v26, %v4663_v36 }
 0x31b   :  { %v2307_v9 = vpack.c.bf16 %v2107_v28, %v2106_v34  ;;  %v2400_v11 = vpack.c.b16 %v2384_v13, %v2384_v13  ;;  %v1818_v53 = vadd.f32 %v4786_v26, %v4678_v55  ;;  %v2110_v60 = vmax.f32 %v1666_v59, 0.0  ;;  %v5079_v28 = vld [vmem:[#allocation50_spill] sm:$0xff] }
 0x31c   :  { %2484 = vmatpush.bf16.msra.mxu2 %v4657_v37  ;;  %2500 = vmatpush.bf16.msra.mxu3 %v2284_v18  ;;  %v1651_v37 = vadd.f32 %v4786_v26, %v4653_v0  ;;  %v2112_v0 = vmax.f32 %v1671_v45, 0.0  ;;  %v1631_v56 = vadd.f32 %v4786_v26, %v4544_v7  ;;  %v1633_v29 = vadd.f32 %v4786_v26, %v4559_v16  ;;  %v5074_v16 = vld [vmem:[#allocation60_spill] sm:$0xff]  ;;  %v5080_v45 = vld [vmem:[#allocation66_spill] sm:$0xff] }
 0x31d   :  { %2628 = vmatpush.bf16.msra.mxu1 %v2366_v35  ;;  %v1668_v35 = vadd.f32 %v4786_v26, %v4768_v8  ;;  %v1661_v8 = vadd.f32 %v4786_v26, %v4724_v21  ;;  %v2099_v47 = vmax.f32 %v1638_v24, 0.0  ;;  %v2170_v55 = vmax.f32 %v1816_v48, 0.0 }
 0x31e   :  { %v2104_v5 = vmax.f32 %v1651_v37, 0.0  ;;  %v2171_v15 = vmax.f32 %v1818_v53, 0.0  ;;  %v1813_v7 = vadd.f32 %v4786_v26, %v4651_v58  ;;  %v2388_v27 = vunpack.c.l.b16 %v5073_v6  ;;  %v5086_v53 = vld [vmem:[#allocation70_spill] sm:$0xff]  ;;  %v5091_v6 = vld [vmem:[#allocation61_spill] sm:$0xff] }
 0x31f   :  { %2501 = vmatmul.bf16.vlgmr.msra.gmra.mxu3 %v2401_v42  ;;  %v2111_v19 = vmax.f32 %v1668_v35, 0.0  ;;  %v2108_v39 = vmax.f32 %v1661_v8, 0.0  ;;  %v1628_v1 = vadd.f32 %v4786_v26, %v5075_v43  ;;  %v2096_v51 = vmax.f32 %v1631_v56, 0.0  ;;  %v5076_v42 = vld [vmem:[#allocation68_spill] sm:$0xff] }
 0x320   :  { %2532 = vmatpush.bf16.msrb.mxu3 %v5068_v4  ;;  %2485 = vmatpush.bf16.msra.mxu2 %v4630_v61  ;;  %v1673_v61 = vadd.f32 %v4786_v26, %v1672_v41  ;;  %v2306_v30 = vpack.c.bf16 %v2105_v12, %v2104_v5  ;;  %v2339_v32 = vpack.c.bf16 %v2171_v15, %v2170_v55  ;;  %v2097_v46 = vmax.f32 %v1633_v29, 0.0  ;;  %v5077_v4 = vld [vmem:[#allocation69_spill] sm:$0xff]  ;;  %v5081_v5 = vld [vmem:[#allocation67_spill] sm:$0xff] }
 0x321   :  { %2629 = vmatpush.bf16.msra.mxu1 %v2365_v22  ;;  %v2309_v22 = vpack.c.bf16 %v2111_v19, %v2110_v60  ;;  %v1808_v58 = vadd.f32 %v4786_v26, %v5077_v4  ;;  %v2169_v44 = vmax.f32 %v1813_v7, 0.0  ;;  %v2095_v41 = vmax.f32 %v1628_v1, 0.0  ;;  %v5088_v19 = vld [vmem:[#allocation40_spill] sm:$0xff]  ;;  %v5089_v55 = vld [vmem:[#allocation59_spill] sm:$0xff] }
 0x322   :  { %v2113_v2 = vmax.f32 %v1673_v61, 0.0  ;;  %v1776_v34 = vadd.f32 %v4786_v26, %v5078_v20  ;;  %v1778_v13 = vadd.f32 %v4786_v26, %v5079_v28  ;;  %v2302_v61 = vpack.c.bf16 %v2097_v46, %v2096_v51  ;;  %v4884_v20 = vld [vmem:[%s4989_s3 + $0x30] sm:$0xff]  ;;  %v5098_v28 = vld [vmem:[#allocation53_spill] sm:$0xff] }
 0x323   :  { %v1803_v12 = vadd.f32 %v4786_v26, %v5081_v5  ;;  %v2387_v8 = vunpack.c.h.b16 %v5086_v53  ;;  %v1768_v56 = vadd.f32 %v4786_v26, %v5088_v19  ;;  %v1791_v15 = vadd.f32 %v4786_v26, %v5089_v55  ;;  %v5104_v19 = vld [vmem:[#allocation44_spill] sm:$0xff] }
 0x324   :  { %2533 = vmatpush.bf16.msrb.mxu3 %v5069_v54  ;;  %2486 = vmatpush.bf16.msra.mxu2 %v4614_v25  ;;  %v1641_v25 = vadd.f32 %v4786_v26, %v4603_v38  ;;  %v2310_v31 = vpack.c.bf16 %v2113_v2, %v2112_v0  ;;  %v5072_v38 = vld [vmem:[#allocation5_spill] sm:$0xff]  ;;  %v2404_v54 = vpack.c.b16 %v2388_v27, %v2388_v27  ;;  %v2154_v59 = vmax.f32 %v1776_v34, 0.0  ;;  %v5092_v27 = vld [vmem:[#allocation34_spill] sm:$0xff] }
 0x325   :  { %2630 = vmatpush.bf16.msra.mxu1 %v2364_v50  ;;  %v2155_v35 = vmax.f32 %v1778_v13, 0.0  ;;  %v2403_v7 = vpack.c.b16 %v2387_v8, %v2387_v8  ;;  %v2151_v51 = vmax.f32 %v1768_v56, 0.0  ;;  %v1781_v13 = vadd.f32 %v4786_v26, %v5098_v28 }
 0x326   :  { %v2100_v10 = vmax.f32 %v1641_v25, 0.0  ;;  %v5083_v25 = vld [vmem:[#allocation45_spill] sm:$0xff]  ;;  %v1926_v56 = vadd.f32 %v4786_v26, %v5104_v19 }
 0x327   :  { %v1773_v3 = vadd.f32 %v4786_v26, %v5083_v25 }
 0x328   :  { %2534 = vmatpush.bf16.msrb.mxu3 %v5070_v33  ;;  %2487 = vmatpush.bf16.msra.mxu2 %v4582_v62  ;;  %v1636_v62 = vadd.f32 %v4786_v26, %v4574_v49  ;;  %v1663_v49 = vadd.f32 %v4786_v26, %v4734_v63  ;;  %v2304_v17 = vpack.c.bf16 %v2101_v57, %v2100_v10  ;;  %v2165_v57 = vmax.f32 %v1803_v12, 0.0 }
 0x329   :  { %v1811_v63 = vadd.f32 %v4786_v26, %v4634_v14  ;;  %v1806_v14 = vadd.f32 %v4786_v26, %v5076_v42  ;;  %v1801_v33 = vadd.f32 %v4786_v26, %v5080_v45  ;;  %v5095_v42 = vld [vmem:[#allocation58_spill] sm:$0xff] }
 0x32a   :  { %v2098_v36 = vmax.f32 %v1636_v62, 0.0  ;;  %v2109_v21 = vmax.f32 %v1663_v49, 0.0  ;;  %v5084_v62 = vld [vmem:[#allocation64_spill] sm:$0xff]  ;;  %v5087_v49 = vld [vmem:[#allocation38_spill] sm:$0xff] }
 0x32b   :  { %2488 = vmatmul.bf16.vlgmr.msra.gmra.mxu2 %v2400_v11  ;;  %v2168_v52 = vmax.f32 %v1811_v63, 0.0  ;;  %v2167_v11 = vmax.f32 %v1808_v58, 0.0  ;;  %v1796_v24 = vadd.f32 %v4786_v26, %v5084_v62  ;;  %v2164_v10 = vmax.f32 %v1801_v33, 0.0 }
 0x32c   :  { %2519 = vmatpush.bf16.msrb.mxu2 %v2307_v9  ;;  %2535 = vmatpush.bf16.msrb.mxu3 %v5071_v23  ;;  %v2308_v18 = vpack.c.bf16 %v2109_v21, %v2108_v39  ;;  %v2303_v50 = vpack.c.bf16 %v2099_v47, %v2098_v36  ;;  %v2166_v9 = vmax.f32 %v1806_v14, 0.0  ;;  %v5082_v23 = vld [vmem:[#allocation43_spill] sm:$0xff]  ;;  %v1766_v60 = vadd.f32 %v4786_v26, %v5087_v49  ;;  %v5090_v39 = vld [vmem:[#allocation62_spill] sm:$0xff] }
 0x32d   :  { %v2338_v0 = vpack.c.bf16 %v2169_v44, %v2168_v52  ;;  %v1771_v2 = vadd.f32 %v4786_v26, %v5082_v23  ;;  %v2153_v36 = vmax.f32 %v1773_v3, 0.0  ;;  %v2331_v47 = vpack.c.bf16 %v2155_v35, %v2154_v59  ;;  %v5096_v52 = vld [vmem:[#allocation30_spill] sm:$0xff] }
 0x32e   :  { %v2337_v48 = vpack.c.bf16 %v2167_v11, %v2166_v9  ;;  %v1793_v21 = vadd.f32 %v4786_v26, %v5090_v39  ;;  %v2336_v63 = vpack.c.bf16 %v2165_v57, %v2164_v10  ;;  %v2150_v1 = vmax.f32 %v1766_v60, 0.0  ;;  %v2241_v57 = vld [vmem:[%s4989_s3 + $0x28] sm:$0xff] }
 0x32f   :  { %v2152_v29 = vmax.f32 %v1771_v2, 0.0  ;;  %v1788_v14 = vadd.f32 %v4786_v26, %v5095_v42  ;;  %v1756_v44 = vadd.f32 %v4786_v26, %v5096_v52  ;;  %v2392_v33 = vunpack.c.l.b16 %v4884_v20  ;;  %v5101_v2 = vld [vmem:[#allocation56_spill] sm:$0xff]  ;;  %v5113_v52 = vld [vmem:[#allocation35_spill] sm:$0xff] }
 0x330   :  { %2520 = vmatpush.bf16.msrb.mxu2 %v2306_v30  ;;  %2536 = vmatpush.bf16.msrb.mxu3 %v5072_v38  ;;  %v2161_v4 = vmax.f32 %v1793_v21, 0.0  ;;  %v2329_v45 = vpack.c.bf16 %v2151_v51, %v2150_v1  ;;  %v1938_v25 = vadd.f32 %v4786_v26, %v5101_v2  ;;  %v2156_v62 = vmax.f32 %v1781_v13, 0.0 }
 0x331   :  { %v2159_v9 = vmax.f32 %v1788_v14, 0.0  ;;  %v2408_v3 = vpack.c.b16 %v2392_v33, %v2392_v33  ;;  %v2391_v60 = vunpack.c.h.b16 %v2241_v57  ;;  %v2214_v1 = vmax.f32 %v1926_v56, 0.0  ;;  %v5112_v14 = vld [vmem:[#allocation23_spill] sm:$0xff]  ;;  %v5116_v33 = vld [vmem:[#allocation20_spill] sm:$0xff] }
 0x332   :  { %v2219_v49 = vmax.f32 %v1938_v25, 0.0  ;;  %v2390_v13 = vunpack.c.l.b16 %v2241_v57  ;;  %v5119_v25 = vld [vmem:[#allocation33_spill] sm:$0xff]  ;;  %v5121_v57 = vld [vmem:[#allocation18_spill] sm:$0xff]  ;;  %v5123_v56 = vld [vmem:[#allocation28_spill] sm:$0xff] }
 0x333   :  { %2592 = vmatmul.bf16.vlgmr.msrb.gmra.mxu1 %v2408_v3  ;;  %v1913_v3 = vadd.f32 %v4786_v26, %v5119_v25 }
 0x334   :  { %2521 = vmatpush.bf16.msrb.mxu2 %v4643_v40  ;;  %2537 = vmatpush.bf16.msrb.mxu3 %v2310_v31  ;;  %v1626_v40 = vadd.f32 %v4786_v26, %v5074_v16  ;;  %v5085_v31 = vld [vmem:[#allocation65_spill] sm:$0xff]  ;;  %v1761_v16 = vadd.f32 %v4786_v26, %v5092_v27  ;;  %v5108_v27 = vld [vmem:[#allocation39_spill] sm:$0xff] }
 0x335   :  { %v1798_v38 = vadd.f32 %v4786_v26, %v5085_v31  ;;  %v5102_v31 = vld [vmem:[#allocation49_spill] sm:$0xff] }
 0x336   :  { %v2094_v37 = vmax.f32 %v1626_v40, 0.0  ;;  %v5093_v40 = vld [vmem:[#allocation36_spill] sm:$0xff] }
 0x337   :  { %v1763_v43 = vadd.f32 %v4786_v26, %v5093_v40  ;;  %v5109_v40 = vld [vmem:[#allocation41_spill] sm:$0xff] }
 0x338   :  { %2522 = vmatpush.bf16.msrb.mxu2 %v2304_v17  ;;  %2538 = vmatpush.bf16.msrb.mxu3 %v2309_v22  ;;  %v2301_v30 = vpack.c.bf16 %v2095_v41, %v2094_v37  ;;  %v2162_v22 = vmax.f32 %v1796_v24, 0.0  ;;  %v2163_v17 = vmax.f32 %v1798_v38, 0.0  ;;  %v2148_v41 = vmax.f32 %v1761_v16, 0.0 }
 0x339   :  { %v2149_v34 = vmax.f32 %v1763_v43, 0.0  ;;  %v1931_v38 = vadd.f32 %v4786_v26, %v5102_v31  ;;  %v1921_v16 = vadd.f32 %v4786_v26, %v5108_v27  ;;  %v1923_v43 = vadd.f32 %v4786_v26, %v5109_v40 }
 0x33a   :  { %v2335_v58 = vpack.c.bf16 %v2163_v17, %v2162_v22  ;;  %v2407_v22 = vpack.c.b16 %v2391_v60, %v2391_v60  ;;  %v5106_v17 = vld [vmem:[#allocation24_spill] sm:$0xff] }
 0x33b   :  { %v2328_v35 = vpack.c.bf16 %v2149_v34, %v2148_v41  ;;  %v2212_v41 = vmax.f32 %v1921_v16, 0.0  ;;  %v2213_v34 = vmax.f32 %v1923_v43, 0.0  ;;  %v5127_v16 = vld [vmem:[#allocation26_spill] sm:$0xff] }
 0x33c   :  { %2523 = vmatpush.bf16.msrb.mxu2 %v2303_v50  ;;  %2539 = vmatpush.bf16.msrb.mxu3 %v2308_v18  ;;  %v2330_v18 = vpack.c.bf16 %v2153_v36, %v2152_v29  ;;  %v2160_v50 = vmax.f32 %v1791_v15, 0.0  ;;  %v5105_v29 = vld [vmem:[#allocation46_spill] sm:$0xff]  ;;  %v2216_v15 = vmax.f32 %v1931_v38, 0.0  ;;  %v1901_v40 = vadd.f32 %v4786_v26, %v5127_v16 }
 0x33d   :  { %v1928_v36 = vadd.f32 %v4786_v26, %v5105_v29  ;;  %v5120_v38 = vld [vmem:[#allocation42_spill] sm:$0xff]  ;;  %v1906_v29 = vadd.f32 %v4786_v26, %v5123_v56 }
 0x33e   :  { %v2334_v11 = vpack.c.bf16 %v2161_v4, %v2160_v50  ;;  %v1893_v50 = vadd.f32 %v4786_v26, %v5112_v14  ;;  %v5129_v14 = vld [vmem:[#allocation12_spill] sm:$0xff] }
 0x33f   :  { %2540 = vmatmul.bf16.vlgmr.msrb.gmra.mxu3 %v2404_v54  ;;  %v5097_v54 = vld [vmem:[#allocation32_spill] sm:$0xff]  ;;  %v2215_v51 = vmax.f32 %v1928_v36, 0.0 }
 0x340   :  { %2571 = vmatpush.bf16.msra.mxu3 %v2339_v32  ;;  %2524 = vmatpush.bf16.msrb.mxu2 %v2302_v61  ;;  %v5094_v32 = vld [vmem:[#allocation57_spill] sm:$0xff]  ;;  %v1758_v37 = vadd.f32 %v4786_v26, %v5097_v54  ;;  %v5099_v61 = vld [vmem:[#allocation55_spill] sm:$0xff] }
 0x341   :  { %v1786_v46 = vadd.f32 %v4786_v26, %v5094_v32  ;;  %v1783_v5 = vadd.f32 %v4786_v26, %v5099_v61  ;;  %v5114_v54 = vld [vmem:[#allocation37_spill] sm:$0xff]  ;;  %v2361_v28 = vpack.c.bf16 %v2215_v51, %v2214_v1  ;;  %v1886_v61 = vadd.f32 %v4786_v26, %v5116_v33  ;;  %v5128_v1 = vld [vmem:[#allocation27_spill] sm:$0xff]  ;;  %v5132_v33 = vld [vmem:[#allocation10_spill] sm:$0xff] }
 0x342   :  { %v2147_v59 = vmax.f32 %v1758_v37, 0.0  ;;  %v1918_v37 = vadd.f32 %v4786_v26, %v5114_v54  ;;  %v1903_v51 = vadd.f32 %v4786_v26, %v5128_v1  ;;  %v2204_v54 = vmax.f32 %v1901_v40, 0.0 }
 0x343   :  { %v2158_v12 = vmax.f32 %v1786_v46, 0.0  ;;  %v2157_v24 = vmax.f32 %v1783_v5, 0.0  ;;  %v5110_v46 = vld [vmem:[#allocation52_spill] sm:$0xff]  ;;  %v5117_v5 = vld [vmem:[#allocation21_spill] sm:$0xff]  ;;  %v2198_v60 = vmax.f32 %v1886_v61, 0.0  ;;  %v1868_v61 = vadd.f32 %v4786_v26, %v5132_v33 }
 0x344   :  { %2572 = vmatpush.bf16.msra.mxu3 %v2338_v0  ;;  %2525 = vmatpush.bf16.msrb.mxu2 %v2301_v30  ;;  %v5100_v0 = vld [vmem:[#allocation54_spill] sm:$0xff]  ;;  %v2146_v30 = vmax.f32 %v1756_v44, 0.0  ;;  %v1916_v44 = vadd.f32 %v4786_v26, %v5113_v52 }
 0x345   :  { %v1936_v23 = vadd.f32 %v4786_v26, %v5100_v0  ;;  %v2333_v10 = vpack.c.bf16 %v2159_v9, %v2158_v12  ;;  %v2332_v55 = vpack.c.bf16 %v2157_v24, %v2156_v62  ;;  %v1888_v12 = vadd.f32 %v4786_v26, %v5117_v5 }
 0x346   :  { %v2360_v62 = vpack.c.bf16 %v2213_v34, %v2212_v41  ;;  %v2406_v24 = vpack.c.b16 %v2390_v13, %v2390_v13  ;;  %v5131_v13 = vld [vmem:[#allocation9_spill] sm:$0xff] }
 0x347   :  { %v2218_v8 = vmax.f32 %v1936_v23, 0.0  ;;  %v5118_v23 = vld [vmem:[#allocation31_spill] sm:$0xff]  ;;  %v2199_v19 = vmax.f32 %v1888_v12, 0.0 }
 0x348   :  { %2573 = vmatpush.bf16.msra.mxu3 %v2337_v48  ;;  %2526 = vmatpush.bf16.msrb.mxu2 %v5091_v6  ;;  %v5103_v48 = vld [vmem:[#allocation51_spill] sm:$0xff]  ;;  %v1911_v2 = vadd.f32 %v4786_v26, %v5118_v23 }
 0x349   :  { %v1933_v53 = vadd.f32 %v4786_v26, %v5103_v48  ;;  %v2363_v21 = vpack.c.bf16 %v2219_v49, %v2218_v8  ;;  %v1881_v48 = vadd.f32 %v4786_v26, %v5121_v57  ;;  %v2353_v43 = vpack.c.bf16 %v2199_v19, %v2198_v60 }
 0x34a   :  { %v2393_v60 = vunpack.c.h.b16 %v4884_v20 }
 0x34b   :  { %2527 = vmatmul.bf16.vlgmr.msrb.gmra.mxu2 %v2403_v7  ;;  %v2217_v39 = vmax.f32 %v1933_v53, 0.0  ;;  %v5107_v7 = vld [vmem:[#allocation25_spill] sm:$0xff]  ;;  %v5122_v53 = vld [vmem:[#allocation19_spill] sm:$0xff] }
 0x34c   :  { %2558 = vmatpush.bf16.msra.mxu2 %v2331_v47  ;;  %2574 = vmatpush.bf16.msra.mxu3 %v2336_v63  ;;  %v2327_v47 = vpack.c.bf16 %v2147_v59, %v2146_v30  ;;  %v1896_v63 = vadd.f32 %v4786_v26, %v5106_v17  ;;  %v1898_v6 = vadd.f32 %v4786_v26, %v5107_v7  ;;  %v2210_v30 = vmax.f32 %v1916_v44, 0.0  ;;  %v2243_v59 = vld [vmem:[%s4989_s3 + $0x38] sm:$0xff] }
 0x34d   :  { %v2362_v32 = vpack.c.bf16 %v2217_v39, %v2216_v15  ;;  %v2395_v31 = vunpack.c.h.b16 %v2243_v59  ;;  %v1883_v8 = vadd.f32 %v4786_v26, %v5122_v53  ;;  %v2208_v15 = vmax.f32 %v1911_v2, 0.0  ;;  %v5133_v2 = vld [vmem:[#allocation6_spill] sm:$0xff] }
 0x34e   :  { %v2202_v4 = vmax.f32 %v1896_v63, 0.0  ;;  %v2209_v39 = vmax.f32 %v1913_v3, 0.0  ;;  %v5126_v63 = vld [vmem:[#allocation17_spill] sm:$0xff]  ;;  %v1861_v25 = vadd.f32 %v4786_v26, %v5133_v2  ;;  %v5134_v3 = vld [vmem:[#allocation7_spill] sm:$0xff] }
 0x34f   :  { %v2411_v49 = vpack.c.b16 %v2395_v31, %v2395_v31  ;;  %v1878_v7 = vadd.f32 %v4786_v26, %v5126_v63  ;;  %v2197_v27 = vmax.f32 %v1883_v8, 0.0 }
 0x350   :  { %2559 = vmatpush.bf16.msra.mxu2 %v2330_v18  ;;  %2575 = vmatpush.bf16.msra.mxu3 %v2335_v58  ;;  %v5111_v18 = vld [vmem:[#allocation22_spill] sm:$0xff]  ;;  %v2203_v58 = vmax.f32 %v1898_v6, 0.0  ;;  %v2196_v6 = vmax.f32 %v1881_v48, 0.0  ;;  %v2188_v48 = vmax.f32 %v1861_v25, 0.0 }
 0x351   :  { %v1891_v42 = vadd.f32 %v4786_v26, %v5111_v18  ;;  %2631 = vmatmul.bf16.vlgmr.msra.gmra.mxu1 %v2411_v49  ;;  %v2358_v18 = vpack.c.bf16 %v2209_v39, %v2208_v15  ;;  %v2195_v44 = vmax.f32 %v1878_v7, 0.0 }
 0x352   :  { %v2355_v0 = vpack.c.bf16 %v2203_v58, %v2202_v4  ;;  %v5130_v4 = vld [vmem:[#allocation13_spill] sm:$0xff]  ;;  %v2352_v41 = vpack.c.bf16 %v2197_v27, %v2196_v6 }
 0x353   :  { %v2200_v9 = vmax.f32 %v1891_v42, 0.0  ;;  %v1873_v58 = vadd.f32 %v4786_v26, %v5130_v4  ;;  %v2638_v4 = vld [vmem:[%s4991_s4 + $0x10] sm:$0xff] }
 0x354   :  { %2560 = vmatpush.bf16.msra.mxu2 %v2329_v45  ;;  %2576 = vmatpush.bf16.msra.mxu3 %v2334_v11  ;;  %v5115_v45 = vld [vmem:[#allocation47_spill] sm:$0xff]  ;;  %v2201_v11 = vmax.f32 %v1893_v50, 0.0  ;;  %v1871_v50 = vadd.f32 %v4786_v26, %v5129_v14 }
 0x355   :  { %v2193_v12 = vmax.f32 %v1873_v58, 0.0 }
 0x356   :  { %v2354_v36 = vpack.c.bf16 %v2201_v11, %v2200_v9  ;;  %v2192_v5 = vmax.f32 %v1871_v50, 0.0  ;;  %v2639_v50 = vld [vmem:[%s4991_s4 + $0x18] sm:$0xff] }
 0x358   :  { %2561 = vmatpush.bf16.msra.mxu2 %v2328_v35  ;;  %2577 = vmatpush.bf16.msra.mxu3 %v2333_v10  ;;  %v2211_v35 = vmax.f32 %v1918_v37, 0.0  ;;  %v2437_v10 = vpop.f32.mrf.mxu1  ;;  %v2205_v37 = vmax.f32 %v1903_v51, 0.0 }
 0x35a   :  { %v2356_v11 = vpack.c.bf16 %v2205_v37, %v2204_v54 }
 0x35c   :  { %2562 = vmatpush.bf16.msra.mxu2 %v2327_v47  ;;  %2578 = vmatpush.bf16.msra.mxu3 %v2332_v55  ;;  %v5124_v47 = vld [vmem:[#allocation29_spill] sm:$0xff] }
 0x35d   :  { %v1908_v55 = vadd.f32 %v4786_v26, %v5124_v47 }
 0x35f   :  { %2579 = vmatmul.bf16.vlgmr.msra.gmra.mxu3 %v2407_v22  ;;  %v5125_v22 = vld [vmem:[#allocation15_spill] sm:$0xff] }
 0x360   :  { %2610 = vmatpush.bf16.msrb.mxu3 %v2363_v21  ;;  %2563 = vmatpush.bf16.msra.mxu2 %v5110_v46  ;;  %v2359_v21 = vpack.c.bf16 %v2211_v35, %v2210_v30  ;;  %v1876_v17 = vadd.f32 %v4786_v26, %v5125_v22  ;;  %v2207_v46 = vmax.f32 %v1908_v55, 0.0  ;;  %v2439_v42 = vpop.f32.mrf.mxu1  ;;  %v1863_v30 = vadd.f32 %v4786_v26, %v5134_v3 }
 0x362   :  { %v2194_v52 = vmax.f32 %v1876_v17, 0.0  ;;  %v2189_v53 = vmax.f32 %v1863_v30, 0.0 }
 0x364   :  { %2611 = vmatpush.bf16.msrb.mxu3 %v2362_v32  ;;  %2564 = vmatpush.bf16.msra.mxu2 %v5115_v45  ;;  %v2206_v32 = vmax.f32 %v1906_v29, 0.0  ;;  %v1866_v45 = vadd.f32 %v4786_v26, %v5131_v13  ;;  %v2351_v9 = vpack.c.bf16 %v2195_v44, %v2194_v52  ;;  %v2348_v29 = vpack.c.bf16 %v2189_v53, %v2188_v48  ;;  %v2637_v52 = vld [vmem:[%s4991_s4 + $0x8] sm:$0xff]  ;;  %v2636_v44 = vld [vmem:[%s4991_s4] sm:$0xff] }
 0x365   :  { %v2409_v26 = vpack.c.b16 %v2393_v60, %v2393_v60 }
 0x366   :  { %v2357_v34 = vpack.c.bf16 %v2207_v46, %v2206_v32  ;;  %v2190_v35 = vmax.f32 %v1866_v45, 0.0 }
 0x368   :  { %2612 = vmatpush.bf16.msrb.mxu3 %v2361_v28  ;;  %2565 = vmatpush.bf16.msra.mxu2 %v5120_v38  ;;  %v2394_v28 = vunpack.c.l.b16 %v2243_v59  ;;  %v2476_v23 = vpop.f32.mrf.mxu1  ;;  %v2450_v59 = vpop.f32.mrf.mxu2 }
 0x369   :  { %v2451_v31 = vadd.f32 %v2450_v59, %v2437_v10 }
 0x36b   :  { %2566 = vmatmul.bf16.vlgmr.msra.gmra.mxu2 %v2406_v24  ;;  %v2350_v24 = vpack.c.bf16 %v2193_v12, %v2192_v5 }
 0x36c   :  { %2597 = vmatpush.bf16.msrb.mxu2 %v2355_v0  ;;  %2613 = vmatpush.bf16.msrb.mxu3 %v2360_v62  ;;  %v2410_v0 = vpack.c.b16 %v2394_v28, %v2394_v28  ;;  %v2191_v62 = vmax.f32 %v1868_v61, 0.0  ;;  %v2463_v38 = vpop.f32.mrf.mxu3 }
 0x36d   :  { %v2464_v57 = vadd.f32 %v2463_v38, %v2451_v31 }
 0x36e   :  { %v2349_v8 = vpack.c.bf16 %v2191_v62, %v2190_v35 }
 0x36f   :  { %v2477_v49 = vadd.f32 %v2476_v23, %v2464_v57 }
 0x370   :  { %2598 = vmatpush.bf16.msrb.mxu2 %v2354_v36  ;;  %2614 = vmatpush.bf16.msrb.mxu3 %v2359_v21  ;;  %v2478_v19 = vpop.f32.mrf.mxu1  ;;  %v2452_v56 = vpop.f32.mrf.mxu2 }
 0x374   :  { %2599 = vmatpush.bf16.msrb.mxu2 %v2353_v43  ;;  %2615 = vmatpush.bf16.msrb.mxu3 %v2358_v18  ;;  %v2465_v36 = vpop.f32.mrf.mxu3 }
 0x378   :  { %2600 = vmatpush.bf16.msrb.mxu2 %v2352_v41  ;;  %2616 = vmatpush.bf16.msrb.mxu3 %v2357_v34  ;;  %v2515_v47 = vpop.f32.mrf.mxu1 }
 0x37c   :  { %2601 = vmatpush.bf16.msrb.mxu2 %v2351_v9  ;;  %2617 = vmatpush.bf16.msrb.mxu3 %v2356_v11  ;;  %v3476_v11 = vld [vmem:[%s4990_s5] ss:$0 sm:$0xff] }
 0x37f   :  { %2618 = vmatmul.bf16.vlgmr.msrb.gmra.mxu3 %v2410_v0 }
 0x380   :  { %2602 = vmatpush.bf16.msrb.mxu2 %v2350_v24  ;;  %v2517_v10 = vpop.f32.mrf.mxu1 }
 0x384   :  { %2603 = vmatpush.bf16.msrb.mxu2 %v2349_v8 }
 0x388   :  { %2604 = vmatpush.bf16.msrb.mxu2 %v2348_v29  ;;  %v2554_v21 = vpop.f32.mrf.mxu1 }
 0x38b   :  { %2605 = vmatmul.bf16.vlgmr.msrb.gmra.mxu2 %v2409_v26 }
 0x38c   :  { %2660 = vmatpush.msra.mxu2 %v2639_v50 }
 0x38e   :  { %2661 = vmatpush.msra.mxu2 %v2638_v4 }
 0x390   :  { %v2556_v6 = vpop.f32.mrf.mxu1  ;;  %2662 = vmatpush.msra.mxu2 %v2637_v52 }
 0x392   :  { %2663 = vmatpush.msra.mxu2 %v2636_v44 }
 0x3a2   :  { %v2502_v55 = vpop.f32.mrf.mxu3 }
 0x3aa   :  { %v2504_v15 = vpop.f32.mrf.mxu3 }
 0x3ae   :  { %v2489_v39 = vpop.f32.mrf.mxu2 }
 0x3af   :  { %v2490_v22 = vadd.f32 %v2489_v39, %v2477_v49 }
 0x3b0   :  { %v2593_v43 = vpop.f32.mrf.mxu1 }
 0x3b1   :  { %v2503_v17 = vadd.f32 %v2502_v55, %v2490_v22 }
 0x3b3   :  { %v2516_v63 = vadd.f32 %v2515_v47, %v2503_v17 }
 0x3b6   :  { %v2491_v7 = vpop.f32.mrf.mxu2 }
 0x3b8   :  { %v2595_v46 = vpop.f32.mrf.mxu1 }
 0x3c2   :  { %v2541_v20 = vpop.f32.mrf.mxu3 }
 0x3ca   :  { %v2543_v27 = vpop.f32.mrf.mxu3 }
 0x3ce   :  { %v2528_v16 = vpop.f32.mrf.mxu2  ;;  %v2632_v42 = vpop.f32.mrf.mxu1 }
 0x3cf   :  { %v2529_v40 = vadd.f32 %v2528_v16, %v2516_v63 }
 0x3d1   :  { %v2542_v1 = vadd.f32 %v2541_v20, %v2529_v40 }
 0x3d3   :  { %v2555_v51 = vadd.f32 %v2554_v21, %v2542_v1 }
 0x3d6   :  { %v2530_v32 = vpop.f32.mrf.mxu2  ;;  %v2634_v54 = vpop.f32.mrf.mxu1 }
 0x3e2   :  { %v2580_v18 = vpop.f32.mrf.mxu3 }
 0x3ea   :  { %v2582_v14 = vpop.f32.mrf.mxu3 }
 0x3ee   :  { %v2567_v58 = vpop.f32.mrf.mxu2 }
 0x3ef   :  { %v2568_v34 = vadd.f32 %v2567_v58, %v2555_v51 }
 0x3f1   :  { %v2581_v28 = vadd.f32 %v2580_v18, %v2568_v34 }
 0x3f3   :  { %v2594_v45 = vadd.f32 %v2593_v43, %v2581_v28 }
 0x3f6   :  { %v2569_v37 = vpop.f32.mrf.mxu2 }
 0x402   :  { %v2619_v41 = vpop.f32.mrf.mxu3 }
 0x40a   :  { %v2621_v13 = vpop.f32.mrf.mxu3 }
 0x40e   :  { %v2606_v33 = vpop.f32.mrf.mxu2 }
 0x40f   :  { %v2607_v61 = vadd.f32 %v2606_v33, %v2594_v45 }
 0x411   :  { %v2620_v5 = vadd.f32 %v2619_v41, %v2607_v61 }
 0x413   :  { %v2633_v12 = vadd.f32 %v2632_v42, %v2620_v5 }
 0x415   :  { %3337 = vmatmul.msk.f32.vlgmr.msra.gmra.mxu2 %vm2644_vm3, %v2633_v12 }
 0x416   :  { %v2608_v9 = vpop.f32.mrf.mxu2 }
 0x498   :  { %v2665_v0 = vpop.f32.mrf.mxu2 }
 0x499   :  { %v2666_v23 = vadd.f32 %v3476_v11, %v2665_v0 }
 0x49b   :  { %v2668_v2 = vmul.f32 %v2666_v23, %v2666_v23 }
 0x49d   :  { %v2669_v25 = vsel %vm2644_vm3, %v2668_v2, 0.0 }
 0x49e   :  { %2670 = vadd.xlane.f32.xlu0 %v2669_v25 }
 0x511   :  { %v2671_v3 = vpop.xlane.xlu0 %2670 }
 0x512   :  { %v2672_v30 = vadd.f32 1e-12, %v2671_v3 }
 0x514   :  { %3477 = vrsqrt.f32 %v2672_v30  ;;  %vm2679_vm5 = vweird.f32 %v2672_v30 }
 0x51a   :  { %v3478_v59 = vpop.eup %3477 }
 0x51b   :  { %v2674_v35 = vmul.f32 %v3478_v59, %v2672_v30  ;;  %vm2680_vm4 = vweird.f32 %v3478_v59 }
 0x51c   :  { %vm2681_vm6 = vmor %vm2679_vm5, %vm2680_vm4 }
 0x51d   :  { %v2675_v62 = vmul.f32 %v3478_v59, %v2674_v35 }
 0x51f   :  { %v2676_v24 = vmul.f32 0.5, %v2675_v62 }
 0x521   :  { %v2677_v31 = vsub.f32 1.5, %v2676_v24 }
 0x523   :  { %v2678_v38 = vmul.f32 %v3478_v59, %v2677_v31 }
 0x525   :  { %v2682_v57 = vsel %vm2681_vm6, %v3478_v59, %v2678_v38 }
 0x526   :  { %v2683_v48 = vmul.f32 %v2682_v57, %v2666_v23 }
 0x528   :  { %2684 = vst.msk [vmem:[%s4992_s6] sm:$0xff] %vm2644_vm3, %v2683_v48 }

</bundles_post_ra>
